<compile_context>
chip_gen: v7x
topology: tpu7x:2x2x1
jax: 0.10.0
libtpu: 0.0.40
codegen_flags: <defaults>
</compile_context>

<pallas_src>
import functools

import jax
import jax.numpy as jnp
from jax.experimental import pallas as pl
from jax.experimental.pallas import tpu as pltpu

_LANE = 128
_SUB = 8              # sublanes per vreg == pixel sub-chunk rows
_MAX_TILE_ROWS = 64   # 64 * 128 = 8192 flat pixels per tile (cap)


def _cdiv(a, b):
    return -(-a // b)


def _round_up(a, b):
    return _cdiv(a, b) * b


# ----------------------------------------------------------------------------- #
# Fused kernel: on-the-fly pyramid pooling + windowed local cost-volume sampling
# for all levels, one (batch, pixel-tile) block at a time.
# ----------------------------------------------------------------------------- #
def _pyramid_local_cv_kernel(bounds_ref, disp_ref, cost_ref, out_ref, *,
                             radius, sample_nums, num_disp, num_levels,
                             tile_rows, num_tiles):
    S1 = sample_nums + 1
    L = num_levels
    D = num_disp

    b = pl.program_id(0)
    t = pl.program_id(1)
    bounds_base = (b * num_tiles + t) * (2 * L)

    def load_slab(l, d, r0):
        # Level-l pooled slab at disparity index d for sub-chunk rows [r0, r0+8).
        # Built on the fly from level-0 slabs (pairwise avg == nested avg_pool1d).
        if l == 0:
            s = cost_ref[0, pl.ds(d, 1), pl.ds(r0, _SUB), :]
            return s.reshape(_SUB, _LANE).astype(jnp.float32)
        return 0.5 * (load_slab(l - 1, 2 * d, r0) + load_slab(l - 1, 2 * d + 1, r0))

    for c in range(tile_rows // _SUB):
        r0 = c * _SUB
        disp_c = disp_ref[0, 0, pl.ds(r0, _SUB), :].astype(jnp.float32)
        for l in range(L):
            Dl = D >> l
            disp_l = disp_c * (0.5 ** l)
            lower = disp_l - radius
            upper = disp_l + radius
            interval = (upper - lower) / float(sample_nums)
            # Clamped candidates, hoisted out of the d loop.  The closed-form
            # weight w_d = max(0, 1 - |cc - d|) reproduces the torch
            # clipped-index / rates-sum-to-1 gather exactly.
            cc = [jnp.clip(lower + float(s) * interval, 0.0, float(Dl - 1))
                  for s in range(S1)]
            d_lo = bounds_ref[bounds_base + 2 * l]
            d_hi = bounds_ref[bounds_base + 2 * l + 1]

            def body(d, accs, cc=cc, l=l, r0=r0):
                d_f = d.astype(jnp.float32)
                slab = load_slab(l, d, r0)          # loaded & cast once per d
                return tuple(
                    accs[s] + slab * jnp.maximum(0.0, 1.0 - jnp.abs(cc[s] - d_f))
                    for s in range(S1))

            init = tuple(jnp.zeros((_SUB, _LANE), jnp.float32) for _ in range(S1))
            accs = jax.lax.fori_loop(d_lo, d_hi + 1, body, init)
            for s in range(S1):
                out_ref[0, l * S1 + s, pl.ds(r0, _SUB), :] = (
                    accs[s].astype(out_ref.dtype))


def pyramid_local_cost_volume(cost_volume, cur_disp, radius, nums_levels,
                              sample_points):
    """Fused pyramid local cost volume.  Returns (B, L*(sample_points+1), H, W)."""
    B, D, H, W = cost_volume.shape

    # Optional disparity upsampling glue (not on the Pallas hot path).
    W_D = cur_disp.shape[-1]
    scale = W // W_D
    if scale != 1:
        # TODO(synk): jax.image.resize(bilinear) only approximately matches
        # F.interpolate(mode='bilinear', align_corners=False).
        Bd, Cd, Hd, Wd = cur_disp.shape
        cur_disp = jax.image.resize(
            cur_disp, (Bd, Cd, Hd * scale, Wd * scale), method="bilinear") * scale

    radius = float(radius)
    sample_nums = int(sample_points) if sample_points is not None else int(2 * radius)
    S1 = sample_nums + 1
    L = int(nums_levels)
    out_dtype = cost_volume.dtype
    cb = jnp.dtype(cost_volume.dtype).itemsize
    ob = jnp.dtype(out_dtype).itemsize

    # ---- lane-dense flattening + VMEM-budget / D-aware pixel tiling ----
    P = H * W
    rows_needed = _cdiv(P, _LANE)

    try:
        vmem_cap = int(pltpu.get_tpu_info().vmem_capacity_bytes)
    except Exception:
        vmem_cap = 64 * 1024 * 1024            # conservative (v7x)
    vmem_limit = max(32 << 20, min(vmem_cap - (16 << 20), 100 << 20))
    budget = vmem_limit // 2                   # for the double-buffered blocks

    row_bytes = _LANE * (2 * (D * cb + 4) + 2 * L * S1 * ob)
    tile_rows = max(_SUB, min(_MAX_TILE_ROWS, (budget // row_bytes) // _SUB * _SUB))
    tile_rows = min(tile_rows, _round_up(rows_needed, _SUB))
    # Guarantee >= 2 grid steps when possible so v7x's 2nd TensorCore has work.
    if B * _cdiv(rows_needed, tile_rows) < 2 and rows_needed > _SUB:
        tile_rows = min(tile_rows, _round_up(_cdiv(rows_needed, 2), _SUB))
    rows_total = _round_up(rows_needed, tile_rows)
    num_tiles = rows_total // tile_rows
    P_pad = rows_total * _LANE

    cost_flat = cost_volume.reshape(B, D, P)
    disp_flat = cur_disp.reshape(B, 1, P).astype(jnp.float32)   # disparity stays f32
    if P_pad != P:
        cost_flat = jnp.pad(cost_flat, ((0, 0), (0, 0), (0, P_pad - P)))
        disp_flat = jnp.pad(disp_flat, ((0, 0), (0, 0), (0, P_pad - P)), mode="edge")
    cost4 = cost_flat.reshape(B, D, rows_total, _LANE)
    disp4 = disp_flat.reshape(B, 1, rows_total, _LANE)

    # ---- per-(batch, tile, level) disparity-window bounds (scalar prefetch) ----
    disp_tiles = disp4.reshape(B, num_tiles, tile_rows * _LANE)
    dmin = jnp.min(disp_tiles, axis=-1)        # (B, num_tiles)
    dmax = jnp.max(disp_tiles, axis=-1)
    per_level = []
    for l in range(L):
        Dl = D >> l
        lo = jnp.clip(dmin * (0.5 ** l) - radius, 0.0, float(Dl - 1))
        hi = jnp.clip(dmax * (0.5 ** l) + radius, 0.0, float(Dl - 1))
        per_level.append(jnp.clip(jnp.floor(lo).astype(jnp.int32) - 1, 0, Dl - 1))
        per_level.append(jnp.clip(jnp.ceil(hi).astype(jnp.int32) + 1, 0, Dl - 1))
    bounds = jnp.stack(per_level, axis=-1).reshape(-1)   # (B*num_tiles*2L,) int32

    kernel = functools.partial(
        _pyramid_local_cv_kernel,
        radius=radius, sample_nums=sample_nums, num_disp=int(D), num_levels=L,
        tile_rows=tile_rows, num_tiles=num_tiles)

    win = [min(D >> l, int(2 * radius) + 4) for l in range(L)]
    flops = int(B * P_pad * sum((6 * S1 + (1 << l)) * w for l, w in enumerate(win)))
    bytes_accessed = int(B * P_pad * (D * cb + 4 + L * S1 * ob))

    out4 = pl.pallas_call(
        kernel,
        out_shape=jax.ShapeDtypeStruct((B, L * S1, rows_total, _LANE), out_dtype),
        grid_spec=pltpu.PrefetchScalarGridSpec(
            num_scalar_prefetch=1,
            grid=(B, num_tiles),
            in_specs=[
                pl.BlockSpec((1, 1, tile_rows, _LANE), lambda b, r, bnd: (b, 0, r, 0)),
                pl.BlockSpec((1, D, tile_rows, _LANE), lambda b, r, bnd: (b, 0, r, 0)),
            ],
            out_specs=pl.BlockSpec((1, L * S1, tile_rows, _LANE),
                                   lambda b, r, bnd: (b, 0, r, 0)),
        ),
        compiler_params=pltpu.CompilerParams(
            dimension_semantics=("parallel", "parallel"),
            vmem_limit_bytes=int(vmem_limit)),
        cost_estimate=pl.CostEstimate(
            flops=flops, transcendentals=0, bytes_accessed=bytes_accessed),
    )(bounds, disp4, cost4)

    out = out4.reshape(B, L * S1, P_pad)[:, :, :P].reshape(B, L * S1, H, W)
    return out


# ----------------------------------------------------------------------------- #
# Standalone single-level helper (API parity with the PyTorch function).
# ----------------------------------------------------------------------------- #
def build_local_cost_volume_fixed(cost_volume, cur_disp, searching_radius,
                                  sample_nums=None):
    if sample_nums is None:
        sample_nums = 2 * searching_radius
    sample_nums = int(sample_nums)
    final = pyramid_local_cost_volume(cost_volume, cur_disp, searching_radius,
                                      1, sample_nums)
    # Sampling candidates (cheap glue, not on the Pallas hot path).
    W_C = cost_volume.shape[-1]
    W_D = cur_disp.shape[-1]
    scale = W_C // W_D
    disp = cur_disp
    if scale != 1:
        Bd, Cd, Hd, Wd = disp.shape
        disp = jax.image.resize(
            disp, (Bd, Cd, Hd * scale, Wd * scale), method="bilinear") * scale
    lower = disp - searching_radius
    upper = disp + searching_radius
    interval = (upper - lower) / float(sample_nums)
    s = jnp.arange(sample_nums + 1, dtype=disp.dtype).reshape(1, -1, 1, 1)
    candidates = lower + s * interval
    return final, candidates


# ----------------------------------------------------------------------------- #
# Module wrapper (no learnable parameters in the PyTorch module).
# ----------------------------------------------------------------------------- #
class PyrmaidCostVolume:
    def __init__(self, radius, nums_levels, sample_points):
        self.radius = radius
        self.nums_levels = nums_levels
        self.sample_points = sample_points

    def __call__(self, cost_volume, radius, cur_disp):
        # NOTE: the reference torch code torch.cat's a list of
        # (final_volume, candidates) tuples (which would error in torch); we
        # concatenate the per-level local cost volumes along the candidate axis.
        return pyramid_local_cost_volume(
            cost_volume, cur_disp, radius, self.nums_levels, self.sample_points)


# ----------------------------------------------------------------------------- #
# Pure-JAX reference (torch-style gather semantics, for correctness check only).
# ----------------------------------------------------------------------------- #
def _reference(cost_volume, cur_disp, radius, nums_levels, sample_points):
    pyramid = [cost_volume]
    cv = cost_volume
    for _ in range(nums_levels - 1):
        D = cv.shape[1]
        cv = 0.5 * (cv[:, 0:(D // 2) * 2:2] + cv[:, 1:(D // 2) * 2:2])
        pyramid.append(cv)
    outs = []
    for i in range(nums_levels):
        corr = pyramid[i]
        D = corr.shape[1]
        disp = cur_disp / (2.0 ** i)
        lower = disp - radius
        upper = disp + radius
        interval = (upper - lower) / float(sample_points)
        s = jnp.arange(sample_points + 1, dtype=cur_disp.dtype).reshape(1, -1, 1, 1)
        cand = lower + s * interval
        ceil_c = jnp.clip(jnp.ceil(cand), 0.0, float(D - 1))
        floor_c = jnp.clip(jnp.floor(cand), 0.0, float(D - 1))
        floor_rate = ceil_c - cand
        ceil_rate = 1.0 - floor_rate
        ceil_vol = jnp.take_along_axis(corr, ceil_c.astype(jnp.int32), axis=1)
        floor_vol = jnp.take_along_axis(corr, floor_c.astype(jnp.int32), axis=1)
        outs.append(ceil_vol * ceil_rate + floor_vol * floor_rate)
    return jnp.concatenate(outs, axis=1)


if __name__ == "__main__":
    key = jax.random.PRNGKey(0)
    k1, k2, k3, k4 = jax.random.split(key, 4)

    # Case 1: pyramid module config.
    B, D, H, W = 2, 16, 16, 16
    radius, nums_levels, sample_points = 4.0, 3, 8
    cost_volume = jax.random.normal(k1, (B, D, H, W), dtype=jnp.float32)
    cur_disp = jax.random.uniform(k2, (B, 1, H, W), dtype=jnp.float32,
                                  minval=0.0, maxval=float(D - 1))

    module = PyrmaidCostVolume(radius, nums_levels, sample_points)
    out = jax.block_until_ready(module(cost_volume, radius, cur_disp))
    ref = _reference(cost_volume, cur_disp, radius, nums_levels, sample_points)
    assert out.shape == (B, nums_levels * (sample_points + 1), H, W), out.shape
    assert jnp.allclose(out, ref, rtol=1e-5, atol=1e-5), float(
        jnp.max(jnp.abs(out - ref)))

    # Case 2: odd spatial size (exercises lane padding + edge-padded disparity
    # and the disparity-window skip with a non-power-of-two D).
    B2, D2, H2, W2 = 1, 12, 7, 9
    cost2 = jax.random.normal(k3, (B2, D2, H2, W2), dtype=jnp.float32)
    disp2 = jax.random.uniform(k4, (B2, 1, H2, W2), dtype=jnp.float32,
                               minval=0.0, maxval=float(D2 - 1))
    out2 = jax.block_until_ready(pyramid_local_cost_volume(cost2, disp2, 2.0, 2, 4))
    ref2 = _reference(cost2, disp2, 2.0, 2, 4)
    assert out2.shape == (B2, 2 * 5, H2, W2), out2.shape
    assert jnp.allclose(out2, ref2, rtol=1e-5, atol=1e-5), float(
        jnp.max(jnp.abs(out2 - ref2)))

    print("KERNEL_OK")
</pallas_src>

<mosaic_0001>
module attributes {stable_mosaic.version = 11 : i64} {
  func.func @_pyramid_local_cv_kernel(%arg0: i32, %arg1: i32, %arg2: memref<12xi32, #tpu.memory_space<smem>>, %arg3: memref<1x1x8x128xf32, #tpu.memory_space<vmem>>, %arg4: memref<1x16x8x128xf32, #tpu.memory_space<vmem>>, %arg5: memref<1x27x8x128xf32, #tpu.memory_space<vmem>>) attributes {dimension_semantics = [#tpu.dimension_semantics<parallel>, #tpu.dimension_semantics<parallel>], iteration_bounds = array<i64: 2, 1>, scalar_prefetch = 1 : i64, scratch_operands = 0 : i64, tpu.core_type = #tpu.core_type<tc>, window_params = [{transform_indices = @transform_0, window_bounds = array<i64: 1, 1, 8, 128>}, {transform_indices = @transform_1, window_bounds = array<i64: 1, 16, 8, 128>}, {transform_indices = @transform_2, window_bounds = array<i64: 1, 27, 8, 128>}]} {
    %c1_i32 = arith.constant 1 : i32
    %0 = arith.muli %arg0, %c1_i32 : i32
    %1 = arith.addi %0, %arg1 : i32
    %c6_i32 = arith.constant 6 : i32
    %2 = arith.muli %1, %c6_i32 : i32
    %c0 = arith.constant 0 : index
    %c0_0 = arith.constant 0 : index
    %c0_1 = arith.constant 0 : index
    %c0_2 = arith.constant 0 : index
    %3 = vector.load %arg3[%c0, %c0_0, %c0_1, %c0_2] : memref<1x1x8x128xf32, #tpu.memory_space<vmem>>, vector<1x1x8x128xf32>
    %4 = vector.shape_cast %3 : vector<1x1x8x128xf32> to vector<8x128xf32>
    %cst = arith.constant 1.000000e+00 : f32
    %5 = vector.broadcast %cst : f32 to vector<8x128xf32>
    %6 = arith.mulf %4, %5 : vector<8x128xf32>
    %cst_3 = arith.constant 4.000000e+00 : f32
    %7 = vector.broadcast %cst_3 : f32 to vector<8x128xf32>
    %8 = arith.subf %6, %7 : vector<8x128xf32>
    %cst_4 = arith.constant 4.000000e+00 : f32
    %9 = vector.broadcast %cst_4 : f32 to vector<8x128xf32>
    %10 = arith.addf %6, %9 : vector<8x128xf32>
    %11 = arith.subf %10, %8 : vector<8x128xf32>
    %cst_5 = arith.constant 8.000000e+00 : f32
    %12 = vector.broadcast %cst_5 : f32 to vector<8x128xf32>
    %13 = arith.divf %11, %12 : vector<8x128xf32>
    %cst_6 = arith.constant 0.000000e+00 : f32
    %14 = vector.broadcast %cst_6 : f32 to vector<8x128xf32>
    %15 = arith.mulf %14, %13 : vector<8x128xf32>
    %16 = arith.addf %8, %15 : vector<8x128xf32>
    %cst_7 = arith.constant 0.000000e+00 : f32
    %cst_8 = arith.constant 1.500000e+01 : f32
    %17 = vector.broadcast %cst_7 : f32 to vector<8x128xf32>
    %18 = arith.maximumf %17, %16 : vector<8x128xf32>
    %19 = vector.broadcast %cst_8 : f32 to vector<8x128xf32>
    %20 = arith.minimumf %19, %18 : vector<8x128xf32>
    %cst_9 = arith.constant 1.000000e+00 : f32
    %21 = vector.broadcast %cst_9 : f32 to vector<8x128xf32>
    %22 = arith.mulf %21, %13 : vector<8x128xf32>
    %23 = arith.addf %8, %22 : vector<8x128xf32>
    %cst_10 = arith.constant 0.000000e+00 : f32
    %cst_11 = arith.constant 1.500000e+01 : f32
    %24 = vector.broadcast %cst_10 : f32 to vector<8x128xf32>
    %25 = arith.maximumf %24, %23 : vector<8x128xf32>
    %26 = vector.broadcast %cst_11 : f32 to vector<8x128xf32>
    %27 = arith.minimumf %26, %25 : vector<8x128xf32>
    %cst_12 = arith.constant 2.000000e+00 : f32
    %28 = vector.broadcast %cst_12 : f32 to vector<8x128xf32>
    %29 = arith.mulf %28, %13 : vector<8x128xf32>
    %30 = arith.addf %8, %29 : vector<8x128xf32>
    %cst_13 = arith.constant 0.000000e+00 : f32
    %cst_14 = arith.constant 1.500000e+01 : f32
    %31 = vector.broadcast %cst_13 : f32 to vector<8x128xf32>
    %32 = arith.maximumf %31, %30 : vector<8x128xf32>
    %33 = vector.broadcast %cst_14 : f32 to vector<8x128xf32>
    %34 = arith.minimumf %33, %32 : vector<8x128xf32>
    %cst_15 = arith.constant 3.000000e+00 : f32
    %35 = vector.broadcast %cst_15 : f32 to vector<8x128xf32>
    %36 = arith.mulf %35, %13 : vector<8x128xf32>
    %37 = arith.addf %8, %36 : vector<8x128xf32>
    %cst_16 = arith.constant 0.000000e+00 : f32
    %cst_17 = arith.constant 1.500000e+01 : f32
    %38 = vector.broadcast %cst_16 : f32 to vector<8x128xf32>
    %39 = arith.maximumf %38, %37 : vector<8x128xf32>
    %40 = vector.broadcast %cst_17 : f32 to vector<8x128xf32>
    %41 = arith.minimumf %40, %39 : vector<8x128xf32>
    %cst_18 = arith.constant 4.000000e+00 : f32
    %42 = vector.broadcast %cst_18 : f32 to vector<8x128xf32>
    %43 = arith.mulf %42, %13 : vector<8x128xf32>
    %44 = arith.addf %8, %43 : vector<8x128xf32>
    %cst_19 = arith.constant 0.000000e+00 : f32
    %cst_20 = arith.constant 1.500000e+01 : f32
    %45 = vector.broadcast %cst_19 : f32 to vector<8x128xf32>
    %46 = arith.maximumf %45, %44 : vector<8x128xf32>
    %47 = vector.broadcast %cst_20 : f32 to vector<8x128xf32>
    %48 = arith.minimumf %47, %46 : vector<8x128xf32>
    %cst_21 = arith.constant 5.000000e+00 : f32
    %49 = vector.broadcast %cst_21 : f32 to vector<8x128xf32>
    %50 = arith.mulf %49, %13 : vector<8x128xf32>
    %51 = arith.addf %8, %50 : vector<8x128xf32>
    %cst_22 = arith.constant 0.000000e+00 : f32
    %cst_23 = arith.constant 1.500000e+01 : f32
    %52 = vector.broadcast %cst_22 : f32 to vector<8x128xf32>
    %53 = arith.maximumf %52, %51 : vector<8x128xf32>
    %54 = vector.broadcast %cst_23 : f32 to vector<8x128xf32>
    %55 = arith.minimumf %54, %53 : vector<8x128xf32>
    %cst_24 = arith.constant 6.000000e+00 : f32
    %56 = vector.broadcast %cst_24 : f32 to vector<8x128xf32>
    %57 = arith.mulf %56, %13 : vector<8x128xf32>
    %58 = arith.addf %8, %57 : vector<8x128xf32>
    %cst_25 = arith.constant 0.000000e+00 : f32
    %cst_26 = arith.constant 1.500000e+01 : f32
    %59 = vector.broadcast %cst_25 : f32 to vector<8x128xf32>
    %60 = arith.maximumf %59, %58 : vector<8x128xf32>
    %61 = vector.broadcast %cst_26 : f32 to vector<8x128xf32>
    %62 = arith.minimumf %61, %60 : vector<8x128xf32>
    %cst_27 = arith.constant 7.000000e+00 : f32
    %63 = vector.broadcast %cst_27 : f32 to vector<8x128xf32>
    %64 = arith.mulf %63, %13 : vector<8x128xf32>
    %65 = arith.addf %8, %64 : vector<8x128xf32>
    %cst_28 = arith.constant 0.000000e+00 : f32
    %cst_29 = arith.constant 1.500000e+01 : f32
    %66 = vector.broadcast %cst_28 : f32 to vector<8x128xf32>
    %67 = arith.maximumf %66, %65 : vector<8x128xf32>
    %68 = vector.broadcast %cst_29 : f32 to vector<8x128xf32>
    %69 = arith.minimumf %68, %67 : vector<8x128xf32>
    %cst_30 = arith.constant 8.000000e+00 : f32
    %70 = vector.broadcast %cst_30 : f32 to vector<8x128xf32>
    %71 = arith.mulf %70, %13 : vector<8x128xf32>
    %72 = arith.addf %8, %71 : vector<8x128xf32>
    %cst_31 = arith.constant 0.000000e+00 : f32
    %cst_32 = arith.constant 1.500000e+01 : f32
    %73 = vector.broadcast %cst_31 : f32 to vector<8x128xf32>
    %74 = arith.maximumf %73, %72 : vector<8x128xf32>
    %75 = vector.broadcast %cst_32 : f32 to vector<8x128xf32>
    %76 = arith.minimumf %75, %74 : vector<8x128xf32>
    %c0_i32 = arith.constant 0 : i32
    %77 = arith.addi %2, %c0_i32 : i32
    %78 = arith.index_cast %77 : i32 to index
    %79 = memref.load %arg2[%78] : memref<12xi32, #tpu.memory_space<smem>>
    %c0_i32_33 = arith.constant 0 : i32
    %80 = arith.addi %2, %c0_i32_33 : i32
    %c1_i32_34 = arith.constant 1 : i32
    %81 = arith.addi %80, %c1_i32_34 : i32
    %82 = arith.index_cast %81 : i32 to index
    %83 = memref.load %arg2[%82] : memref<12xi32, #tpu.memory_space<smem>>
    %cst_35 = arith.constant 0.000000e+00 : f32
    %84 = vector.broadcast %cst_35 : f32 to vector<8x128xf32>
    %cst_36 = arith.constant 0.000000e+00 : f32
    %85 = vector.broadcast %cst_36 : f32 to vector<8x128xf32>
    %cst_37 = arith.constant 0.000000e+00 : f32
    %86 = vector.broadcast %cst_37 : f32 to vector<8x128xf32>
    %cst_38 = arith.constant 0.000000e+00 : f32
    %87 = vector.broadcast %cst_38 : f32 to vector<8x128xf32>
    %cst_39 = arith.constant 0.000000e+00 : f32
    %88 = vector.broadcast %cst_39 : f32 to vector<8x128xf32>
    %cst_40 = arith.constant 0.000000e+00 : f32
    %89 = vector.broadcast %cst_40 : f32 to vector<8x128xf32>
    %cst_41 = arith.constant 0.000000e+00 : f32
    %90 = vector.broadcast %cst_41 : f32 to vector<8x128xf32>
    %cst_42 = arith.constant 0.000000e+00 : f32
    %91 = vector.broadcast %cst_42 : f32 to vector<8x128xf32>
    %cst_43 = arith.constant 0.000000e+00 : f32
    %92 = vector.broadcast %cst_43 : f32 to vector<8x128xf32>
    %c1_i32_44 = arith.constant 1 : i32
    %93 = arith.addi %83, %c1_i32_44 : i32
    %94 = arith.subi %93, %79 : i32
    %95 = arith.addi %79, %94 : i32
    %c1_i32_45 = arith.constant 1 : i32
    %96:9 = scf.for %arg6 = %79 to %95 step %c1_i32_45 iter_args(%arg7 = %84, %arg8 = %85, %arg9 = %86, %arg10 = %87, %arg11 = %88, %arg12 = %89, %arg13 = %90, %arg14 = %91, %arg15 = %92) -> (vector<8x128xf32>, vector<8x128xf32>, vector<8x128xf32>, vector<8x128xf32>, vector<8x128xf32>, vector<8x128xf32>, vector<8x128xf32>, vector<8x128xf32>, vector<8x128xf32>)  : i32 {
      %362 = arith.sitofp %arg6 : i32 to f32
      %c0_216 = arith.constant 0 : index
      %363 = arith.index_cast %arg6 : i32 to index
      %c0_217 = arith.constant 0 : index
      %c0_218 = arith.constant 0 : index
      %364 = vector.load %arg4[%c0_216, %363, %c0_217, %c0_218] : memref<1x16x8x128xf32, #tpu.memory_space<vmem>>, vector<1x1x8x128xf32>
      %365 = vector.shape_cast %364 : vector<1x1x8x128xf32> to vector<1x8x128xf32>
      %366 = vector.shape_cast %365 : vector<1x8x128xf32> to vector<8x128xf32>
      %367 = vector.broadcast %362 : f32 to vector<8x128xf32>
      %368 = arith.subf %20, %367 : vector<8x128xf32>
      %369 = math.absf %368 : vector<8x128xf32>
      %cst_219 = arith.constant 1.000000e+00 : f32
      %370 = vector.broadcast %cst_219 : f32 to vector<8x128xf32>
      %371 = arith.subf %370, %369 : vector<8x128xf32>
      %cst_220 = arith.constant 0.000000e+00 : f32
      %372 = vector.broadcast %cst_220 : f32 to vector<8x128xf32>
      %373 = arith.maximumf %372, %371 : vector<8x128xf32>
      %374 = arith.mulf %366, %373 : vector<8x128xf32>
      %375 = arith.addf %arg7, %374 : vector<8x128xf32>
      %376 = vector.broadcast %362 : f32 to vector<8x128xf32>
      %377 = arith.subf %27, %376 : vector<8x128xf32>
      %378 = math.absf %377 : vector<8x128xf32>
      %cst_221 = arith.constant 1.000000e+00 : f32
      %379 = vector.broadcast %cst_221 : f32 to vector<8x128xf32>
      %380 = arith.subf %379, %378 : vector<8x128xf32>
      %cst_222 = arith.constant 0.000000e+00 : f32
      %381 = vector.broadcast %cst_222 : f32 to vector<8x128xf32>
      %382 = arith.maximumf %381, %380 : vector<8x128xf32>
      %383 = arith.mulf %366, %382 : vector<8x128xf32>
      %384 = arith.addf %arg8, %383 : vector<8x128xf32>
      %385 = vector.broadcast %362 : f32 to vector<8x128xf32>
      %386 = arith.subf %34, %385 : vector<8x128xf32>
      %387 = math.absf %386 : vector<8x128xf32>
      %cst_223 = arith.constant 1.000000e+00 : f32
      %388 = vector.broadcast %cst_223 : f32 to vector<8x128xf32>
      %389 = arith.subf %388, %387 : vector<8x128xf32>
      %cst_224 = arith.constant 0.000000e+00 : f32
      %390 = vector.broadcast %cst_224 : f32 to vector<8x128xf32>
      %391 = arith.maximumf %390, %389 : vector<8x128xf32>
      %392 = arith.mulf %366, %391 : vector<8x128xf32>
      %393 = arith.addf %arg9, %392 : vector<8x128xf32>
      %394 = vector.broadcast %362 : f32 to vector<8x128xf32>
      %395 = arith.subf %41, %394 : vector<8x128xf32>
      %396 = math.absf %395 : vector<8x128xf32>
      %cst_225 = arith.constant 1.000000e+00 : f32
      %397 = vector.broadcast %cst_225 : f32 to vector<8x128xf32>
      %398 = arith.subf %397, %396 : vector<8x128xf32>
      %cst_226 = arith.constant 0.000000e+00 : f32
      %399 = vector.broadcast %cst_226 : f32 to vector<8x128xf32>
      %400 = arith.maximumf %399, %398 : vector<8x128xf32>
      %401 = arith.mulf %366, %400 : vector<8x128xf32>
      %402 = arith.addf %arg10, %401 : vector<8x128xf32>
      %403 = vector.broadcast %362 : f32 to vector<8x128xf32>
      %404 = arith.subf %48, %403 : vector<8x128xf32>
      %405 = math.absf %404 : vector<8x128xf32>
      %cst_227 = arith.constant 1.000000e+00 : f32
      %406 = vector.broadcast %cst_227 : f32 to vector<8x128xf32>
      %407 = arith.subf %406, %405 : vector<8x128xf32>
      %cst_228 = arith.constant 0.000000e+00 : f32
      %408 = vector.broadcast %cst_228 : f32 to vector<8x128xf32>
      %409 = arith.maximumf %408, %407 : vector<8x128xf32>
      %410 = arith.mulf %366, %409 : vector<8x128xf32>
      %411 = arith.addf %arg11, %410 : vector<8x128xf32>
      %412 = vector.broadcast %362 : f32 to vector<8x128xf32>
      %413 = arith.subf %55, %412 : vector<8x128xf32>
      %414 = math.absf %413 : vector<8x128xf32>
      %cst_229 = arith.constant 1.000000e+00 : f32
      %415 = vector.broadcast %cst_229 : f32 to vector<8x128xf32>
      %416 = arith.subf %415, %414 : vector<8x128xf32>
      %cst_230 = arith.constant 0.000000e+00 : f32
      %417 = vector.broadcast %cst_230 : f32 to vector<8x128xf32>
      %418 = arith.maximumf %417, %416 : vector<8x128xf32>
      %419 = arith.mulf %366, %418 : vector<8x128xf32>
      %420 = arith.addf %arg12, %419 : vector<8x128xf32>
      %421 = vector.broadcast %362 : f32 to vector<8x128xf32>
      %422 = arith.subf %62, %421 : vector<8x128xf32>
      %423 = math.absf %422 : vector<8x128xf32>
      %cst_231 = arith.constant 1.000000e+00 : f32
      %424 = vector.broadcast %cst_231 : f32 to vector<8x128xf32>
      %425 = arith.subf %424, %423 : vector<8x128xf32>
      %cst_232 = arith.constant 0.000000e+00 : f32
      %426 = vector.broadcast %cst_232 : f32 to vector<8x128xf32>
      %427 = arith.maximumf %426, %425 : vector<8x128xf32>
      %428 = arith.mulf %366, %427 : vector<8x128xf32>
      %429 = arith.addf %arg13, %428 : vector<8x128xf32>
      %430 = vector.broadcast %362 : f32 to vector<8x128xf32>
      %431 = arith.subf %69, %430 : vector<8x128xf32>
      %432 = math.absf %431 : vector<8x128xf32>
      %cst_233 = arith.constant 1.000000e+00 : f32
      %433 = vector.broadcast %cst_233 : f32 to vector<8x128xf32>
      %434 = arith.subf %433, %432 : vector<8x128xf32>
      %cst_234 = arith.constant 0.000000e+00 : f32
      %435 = vector.broadcast %cst_234 : f32 to vector<8x128xf32>
      %436 = arith.maximumf %435, %434 : vector<8x128xf32>
      %437 = arith.mulf %366, %436 : vector<8x128xf32>
      %438 = arith.addf %arg14, %437 : vector<8x128xf32>
      %439 = vector.broadcast %362 : f32 to vector<8x128xf32>
      %440 = arith.subf %76, %439 : vector<8x128xf32>
      %441 = math.absf %440 : vector<8x128xf32>
      %cst_235 = arith.constant 1.000000e+00 : f32
      %442 = vector.broadcast %cst_235 : f32 to vector<8x128xf32>
      %443 = arith.subf %442, %441 : vector<8x128xf32>
      %cst_236 = arith.constant 0.000000e+00 : f32
      %444 = vector.broadcast %cst_236 : f32 to vector<8x128xf32>
      %445 = arith.maximumf %444, %443 : vector<8x128xf32>
      %446 = arith.mulf %366, %445 : vector<8x128xf32>
      %447 = arith.addf %arg15, %446 : vector<8x128xf32>
      scf.yield %375, %384, %393, %402, %411, %420, %429, %438, %447 : vector<8x128xf32>, vector<8x128xf32>, vector<8x128xf32>, vector<8x128xf32>, vector<8x128xf32>, vector<8x128xf32>, vector<8x128xf32>, vector<8x128xf32>, vector<8x128xf32>
    }
    %c0_46 = arith.constant 0 : index
    %c0_47 = arith.constant 0 : index
    %c0_48 = arith.constant 0 : index
    %c0_49 = arith.constant 0 : index
    %97 = vector.load %arg5[%c0_46, %c0_47, %c0_48, %c0_49] : memref<1x27x8x128xf32, #tpu.memory_space<vmem>>, vector<1x1x8x128xf32>
    %98 = vector.shape_cast %97 : vector<1x1x8x128xf32> to vector<8x128xf32>
    %99 = vector.shape_cast %96#0 : vector<8x128xf32> to vector<1x1x8x128xf32>
    tpu.vector_store %arg5[%c0_46, %c0_47, %c0_48, %c0_49], %99 {strides = array<i32>} : memref<1x27x8x128xf32, #tpu.memory_space<vmem>>, vector<1x1x8x128xf32>,
    %c0_50 = arith.constant 0 : index
    %c1 = arith.constant 1 : index
    %c0_51 = arith.constant 0 : index
    %c0_52 = arith.constant 0 : index
    %100 = vector.load %arg5[%c0_50, %c1, %c0_51, %c0_52] : memref<1x27x8x128xf32, #tpu.memory_space<vmem>>, vector<1x1x8x128xf32>
    %101 = vector.shape_cast %100 : vector<1x1x8x128xf32> to vector<8x128xf32>
    %102 = vector.shape_cast %96#1 : vector<8x128xf32> to vector<1x1x8x128xf32>
    tpu.vector_store %arg5[%c0_50, %c1, %c0_51, %c0_52], %102 {strides = array<i32>} : memref<1x27x8x128xf32, #tpu.memory_space<vmem>>, vector<1x1x8x128xf32>,
    %c0_53 = arith.constant 0 : index
    %c2 = arith.constant 2 : index
    %c0_54 = arith.constant 0 : index
    %c0_55 = arith.constant 0 : index
    %103 = vector.load %arg5[%c0_53, %c2, %c0_54, %c0_55] : memref<1x27x8x128xf32, #tpu.memory_space<vmem>>, vector<1x1x8x128xf32>
    %104 = vector.shape_cast %103 : vector<1x1x8x128xf32> to vector<8x128xf32>
    %105 = vector.shape_cast %96#2 : vector<8x128xf32> to vector<1x1x8x128xf32>
    tpu.vector_store %arg5[%c0_53, %c2, %c0_54, %c0_55], %105 {strides = array<i32>} : memref<1x27x8x128xf32, #tpu.memory_space<vmem>>, vector<1x1x8x128xf32>,
    %c0_56 = arith.constant 0 : index
    %c3 = arith.constant 3 : index
    %c0_57 = arith.constant 0 : index
    %c0_58 = arith.constant 0 : index
    %106 = vector.load %arg5[%c0_56, %c3, %c0_57, %c0_58] : memref<1x27x8x128xf32, #tpu.memory_space<vmem>>, vector<1x1x8x128xf32>
    %107 = vector.shape_cast %106 : vector<1x1x8x128xf32> to vector<8x128xf32>
    %108 = vector.shape_cast %96#3 : vector<8x128xf32> to vector<1x1x8x128xf32>
    tpu.vector_store %arg5[%c0_56, %c3, %c0_57, %c0_58], %108 {strides = array<i32>} : memref<1x27x8x128xf32, #tpu.memory_space<vmem>>, vector<1x1x8x128xf32>,
    %c0_59 = arith.constant 0 : index
    %c4 = arith.constant 4 : index
    %c0_60 = arith.constant 0 : index
    %c0_61 = arith.constant 0 : index
    %109 = vector.load %arg5[%c0_59, %c4, %c0_60, %c0_61] : memref<1x27x8x128xf32, #tpu.memory_space<vmem>>, vector<1x1x8x128xf32>
    %110 = vector.shape_cast %109 : vector<1x1x8x128xf32> to vector<8x128xf32>
    %111 = vector.shape_cast %96#4 : vector<8x128xf32> to vector<1x1x8x128xf32>
    tpu.vector_store %arg5[%c0_59, %c4, %c0_60, %c0_61], %111 {strides = array<i32>} : memref<1x27x8x128xf32, #tpu.memory_space<vmem>>, vector<1x1x8x128xf32>,
    %c0_62 = arith.constant 0 : index
    %c5 = arith.constant 5 : index
    %c0_63 = arith.constant 0 : index
    %c0_64 = arith.constant 0 : index
    %112 = vector.load %arg5[%c0_62, %c5, %c0_63, %c0_64] : memref<1x27x8x128xf32, #tpu.memory_space<vmem>>, vector<1x1x8x128xf32>
    %113 = vector.shape_cast %112 : vector<1x1x8x128xf32> to vector<8x128xf32>
    %114 = vector.shape_cast %96#5 : vector<8x128xf32> to vector<1x1x8x128xf32>
    tpu.vector_store %arg5[%c0_62, %c5, %c0_63, %c0_64], %114 {strides = array<i32>} : memref<1x27x8x128xf32, #tpu.memory_space<vmem>>, vector<1x1x8x128xf32>,
    %c0_65 = arith.constant 0 : index
    %c6 = arith.constant 6 : index
    %c0_66 = arith.constant 0 : index
    %c0_67 = arith.constant 0 : index
    %115 = vector.load %arg5[%c0_65, %c6, %c0_66, %c0_67] : memref<1x27x8x128xf32, #tpu.memory_space<vmem>>, vector<1x1x8x128xf32>
    %116 = vector.shape_cast %115 : vector<1x1x8x128xf32> to vector<8x128xf32>
    %117 = vector.shape_cast %96#6 : vector<8x128xf32> to vector<1x1x8x128xf32>
    tpu.vector_store %arg5[%c0_65, %c6, %c0_66, %c0_67], %117 {strides = array<i32>} : memref<1x27x8x128xf32, #tpu.memory_space<vmem>>, vector<1x1x8x128xf32>,
    %c0_68 = arith.constant 0 : index
    %c7 = arith.constant 7 : index
    %c0_69 = arith.constant 0 : index
    %c0_70 = arith.constant 0 : index
    %118 = vector.load %arg5[%c0_68, %c7, %c0_69, %c0_70] : memref<1x27x8x128xf32, #tpu.memory_space<vmem>>, vector<1x1x8x128xf32>
    %119 = vector.shape_cast %118 : vector<1x1x8x128xf32> to vector<8x128xf32>
    %120 = vector.shape_cast %96#7 : vector<8x128xf32> to vector<1x1x8x128xf32>
    tpu.vector_store %arg5[%c0_68, %c7, %c0_69, %c0_70], %120 {strides = array<i32>} : memref<1x27x8x128xf32, #tpu.memory_space<vmem>>, vector<1x1x8x128xf32>,
    %c0_71 = arith.constant 0 : index
    %c8 = arith.constant 8 : index
    %c0_72 = arith.constant 0 : index
    %c0_73 = arith.constant 0 : index
    %121 = vector.load %arg5[%c0_71, %c8, %c0_72, %c0_73] : memref<1x27x8x128xf32, #tpu.memory_space<vmem>>, vector<1x1x8x128xf32>
    %122 = vector.shape_cast %121 : vector<1x1x8x128xf32> to vector<8x128xf32>
    %123 = vector.shape_cast %96#8 : vector<8x128xf32> to vector<1x1x8x128xf32>
    tpu.vector_store %arg5[%c0_71, %c8, %c0_72, %c0_73], %123 {strides = array<i32>} : memref<1x27x8x128xf32, #tpu.memory_space<vmem>>, vector<1x1x8x128xf32>,
    %cst_74 = arith.constant 5.000000e-01 : f32
    %124 = vector.broadcast %cst_74 : f32 to vector<8x128xf32>
    %125 = arith.mulf %4, %124 : vector<8x128xf32>
    %cst_75 = arith.constant 4.000000e+00 : f32
    %126 = vector.broadcast %cst_75 : f32 to vector<8x128xf32>
    %127 = arith.subf %125, %126 : vector<8x128xf32>
    %cst_76 = arith.constant 4.000000e+00 : f32
    %128 = vector.broadcast %cst_76 : f32 to vector<8x128xf32>
    %129 = arith.addf %125, %128 : vector<8x128xf32>
    %130 = arith.subf %129, %127 : vector<8x128xf32>
    %cst_77 = arith.constant 8.000000e+00 : f32
    %131 = vector.broadcast %cst_77 : f32 to vector<8x128xf32>
    %132 = arith.divf %130, %131 : vector<8x128xf32>
    %cst_78 = arith.constant 0.000000e+00 : f32
    %133 = vector.broadcast %cst_78 : f32 to vector<8x128xf32>
    %134 = arith.mulf %133, %132 : vector<8x128xf32>
    %135 = arith.addf %127, %134 : vector<8x128xf32>
    %cst_79 = arith.constant 0.000000e+00 : f32
    %cst_80 = arith.constant 7.000000e+00 : f32
    %136 = vector.broadcast %cst_79 : f32 to vector<8x128xf32>
    %137 = arith.maximumf %136, %135 : vector<8x128xf32>
    %138 = vector.broadcast %cst_80 : f32 to vector<8x128xf32>
    %139 = arith.minimumf %138, %137 : vector<8x128xf32>
    %cst_81 = arith.constant 1.000000e+00 : f32
    %140 = vector.broadcast %cst_81 : f32 to vector<8x128xf32>
    %141 = arith.mulf %140, %132 : vector<8x128xf32>
    %142 = arith.addf %127, %141 : vector<8x128xf32>
    %cst_82 = arith.constant 0.000000e+00 : f32
    %cst_83 = arith.constant 7.000000e+00 : f32
    %143 = vector.broadcast %cst_82 : f32 to vector<8x128xf32>
    %144 = arith.maximumf %143, %142 : vector<8x128xf32>
    %145 = vector.broadcast %cst_83 : f32 to vector<8x128xf32>
    %146 = arith.minimumf %145, %144 : vector<8x128xf32>
    %cst_84 = arith.constant 2.000000e+00 : f32
    %147 = vector.broadcast %cst_84 : f32 to vector<8x128xf32>
    %148 = arith.mulf %147, %132 : vector<8x128xf32>
    %149 = arith.addf %127, %148 : vector<8x128xf32>
    %cst_85 = arith.constant 0.000000e+00 : f32
    %cst_86 = arith.constant 7.000000e+00 : f32
    %150 = vector.broadcast %cst_85 : f32 to vector<8x128xf32>
    %151 = arith.maximumf %150, %149 : vector<8x128xf32>
    %152 = vector.broadcast %cst_86 : f32 to vector<8x128xf32>
    %153 = arith.minimumf %152, %151 : vector<8x128xf32>
    %cst_87 = arith.constant 3.000000e+00 : f32
    %154 = vector.broadcast %cst_87 : f32 to vector<8x128xf32>
    %155 = arith.mulf %154, %132 : vector<8x128xf32>
    %156 = arith.addf %127, %155 : vector<8x128xf32>
    %cst_88 = arith.constant 0.000000e+00 : f32
    %cst_89 = arith.constant 7.000000e+00 : f32
    %157 = vector.broadcast %cst_88 : f32 to vector<8x128xf32>
    %158 = arith.maximumf %157, %156 : vector<8x128xf32>
    %159 = vector.broadcast %cst_89 : f32 to vector<8x128xf32>
    %160 = arith.minimumf %159, %158 : vector<8x128xf32>
    %cst_90 = arith.constant 4.000000e+00 : f32
    %161 = vector.broadcast %cst_90 : f32 to vector<8x128xf32>
    %162 = arith.mulf %161, %132 : vector<8x128xf32>
    %163 = arith.addf %127, %162 : vector<8x128xf32>
    %cst_91 = arith.constant 0.000000e+00 : f32
    %cst_92 = arith.constant 7.000000e+00 : f32
    %164 = vector.broadcast %cst_91 : f32 to vector<8x128xf32>
    %165 = arith.maximumf %164, %163 : vector<8x128xf32>
    %166 = vector.broadcast %cst_92 : f32 to vector<8x128xf32>
    %167 = arith.minimumf %166, %165 : vector<8x128xf32>
    %cst_93 = arith.constant 5.000000e+00 : f32
    %168 = vector.broadcast %cst_93 : f32 to vector<8x128xf32>
    %169 = arith.mulf %168, %132 : vector<8x128xf32>
    %170 = arith.addf %127, %169 : vector<8x128xf32>
    %cst_94 = arith.constant 0.000000e+00 : f32
    %cst_95 = arith.constant 7.000000e+00 : f32
    %171 = vector.broadcast %cst_94 : f32 to vector<8x128xf32>
    %172 = arith.maximumf %171, %170 : vector<8x128xf32>
    %173 = vector.broadcast %cst_95 : f32 to vector<8x128xf32>
    %174 = arith.minimumf %173, %172 : vector<8x128xf32>
    %cst_96 = arith.constant 6.000000e+00 : f32
    %175 = vector.broadcast %cst_96 : f32 to vector<8x128xf32>
    %176 = arith.mulf %175, %132 : vector<8x128xf32>
    %177 = arith.addf %127, %176 : vector<8x128xf32>
    %cst_97 = arith.constant 0.000000e+00 : f32
    %cst_98 = arith.constant 7.000000e+00 : f32
    %178 = vector.broadcast %cst_97 : f32 to vector<8x128xf32>
    %179 = arith.maximumf %178, %177 : vector<8x128xf32>
    %180 = vector.broadcast %cst_98 : f32 to vector<8x128xf32>
    %181 = arith.minimumf %180, %179 : vector<8x128xf32>
    %cst_99 = arith.constant 7.000000e+00 : f32
    %182 = vector.broadcast %cst_99 : f32 to vector<8x128xf32>
    %183 = arith.mulf %182, %132 : vector<8x128xf32>
    %184 = arith.addf %127, %183 : vector<8x128xf32>
    %cst_100 = arith.constant 0.000000e+00 : f32
    %cst_101 = arith.constant 7.000000e+00 : f32
    %185 = vector.broadcast %cst_100 : f32 to vector<8x128xf32>
    %186 = arith.maximumf %185, %184 : vector<8x128xf32>
    %187 = vector.broadcast %cst_101 : f32 to vector<8x128xf32>
    %188 = arith.minimumf %187, %186 : vector<8x128xf32>
    %cst_102 = arith.constant 8.000000e+00 : f32
    %189 = vector.broadcast %cst_102 : f32 to vector<8x128xf32>
    %190 = arith.mulf %189, %132 : vector<8x128xf32>
    %191 = arith.addf %127, %190 : vector<8x128xf32>
    %cst_103 = arith.constant 0.000000e+00 : f32
    %cst_104 = arith.constant 7.000000e+00 : f32
    %192 = vector.broadcast %cst_103 : f32 to vector<8x128xf32>
    %193 = arith.maximumf %192, %191 : vector<8x128xf32>
    %194 = vector.broadcast %cst_104 : f32 to vector<8x128xf32>
    %195 = arith.minimumf %194, %193 : vector<8x128xf32>
    %c2_i32 = arith.constant 2 : i32
    %196 = arith.addi %2, %c2_i32 : i32
    %197 = arith.index_cast %196 : i32 to index
    %198 = memref.load %arg2[%197] : memref<12xi32, #tpu.memory_space<smem>>
    %c2_i32_105 = arith.constant 2 : i32
    %199 = arith.addi %2, %c2_i32_105 : i32
    %c1_i32_106 = arith.constant 1 : i32
    %200 = arith.addi %199, %c1_i32_106 : i32
    %201 = arith.index_cast %200 : i32 to index
    %202 = memref.load %arg2[%201] : memref<12xi32, #tpu.memory_space<smem>>
    %cst_107 = arith.constant 0.000000e+00 : f32
    %203 = vector.broadcast %cst_107 : f32 to vector<8x128xf32>
    %cst_108 = arith.constant 0.000000e+00 : f32
    %204 = vector.broadcast %cst_108 : f32 to vector<8x128xf32>
    %cst_109 = arith.constant 0.000000e+00 : f32
    %205 = vector.broadcast %cst_109 : f32 to vector<8x128xf32>
    %cst_110 = arith.constant 0.000000e+00 : f32
    %206 = vector.broadcast %cst_110 : f32 to vector<8x128xf32>
    %cst_111 = arith.constant 0.000000e+00 : f32
    %207 = vector.broadcast %cst_111 : f32 to vector<8x128xf32>
    %cst_112 = arith.constant 0.000000e+00 : f32
    %208 = vector.broadcast %cst_112 : f32 to vector<8x128xf32>
    %cst_113 = arith.constant 0.000000e+00 : f32
    %209 = vector.broadcast %cst_113 : f32 to vector<8x128xf32>
    %cst_114 = arith.constant 0.000000e+00 : f32
    %210 = vector.broadcast %cst_114 : f32 to vector<8x128xf32>
    %cst_115 = arith.constant 0.000000e+00 : f32
    %211 = vector.broadcast %cst_115 : f32 to vector<8x128xf32>
    %c1_i32_116 = arith.constant 1 : i32
    %212 = arith.addi %202, %c1_i32_116 : i32
    %213 = arith.subi %212, %198 : i32
    %214 = arith.addi %198, %213 : i32
    %c1_i32_117 = arith.constant 1 : i32
    %215:9 = scf.for %arg6 = %198 to %214 step %c1_i32_117 iter_args(%arg7 = %203, %arg8 = %204, %arg9 = %205, %arg10 = %206, %arg11 = %207, %arg12 = %208, %arg13 = %209, %arg14 = %210, %arg15 = %211) -> (vector<8x128xf32>, vector<8x128xf32>, vector<8x128xf32>, vector<8x128xf32>, vector<8x128xf32>, vector<8x128xf32>, vector<8x128xf32>, vector<8x128xf32>, vector<8x128xf32>)  : i32 {
      %362 = arith.sitofp %arg6 : i32 to f32
      %c2_i32_216 = arith.constant 2 : i32
      %363 = arith.muli %c2_i32_216, %arg6 : i32
      %c0_217 = arith.constant 0 : index
      %364 = arith.index_cast %363 : i32 to index
      %c0_218 = arith.constant 0 : index
      %c0_219 = arith.constant 0 : index
      %365 = vector.load %arg4[%c0_217, %364, %c0_218, %c0_219] : memref<1x16x8x128xf32, #tpu.memory_space<vmem>>, vector<1x1x8x128xf32>
      %366 = vector.shape_cast %365 : vector<1x1x8x128xf32> to vector<1x8x128xf32>
      %367 = vector.shape_cast %366 : vector<1x8x128xf32> to vector<8x128xf32>
      %c2_i32_220 = arith.constant 2 : i32
      %368 = arith.muli %c2_i32_220, %arg6 : i32
      %c1_i32_221 = arith.constant 1 : i32
      %369 = arith.addi %368, %c1_i32_221 : i32
      %c0_222 = arith.constant 0 : index
      %370 = arith.index_cast %369 : i32 to index
      %c0_223 = arith.constant 0 : index
      %c0_224 = arith.constant 0 : index
      %371 = vector.load %arg4[%c0_222, %370, %c0_223, %c0_224] : memref<1x16x8x128xf32, #tpu.memory_space<vmem>>, vector<1x1x8x128xf32>
      %372 = vector.shape_cast %371 : vector<1x1x8x128xf32> to vector<1x8x128xf32>
      %373 = vector.shape_cast %372 : vector<1x8x128xf32> to vector<8x128xf32>
      %374 = arith.addf %367, %373 : vector<8x128xf32>
      %cst_225 = arith.constant 5.000000e-01 : f32
      %375 = vector.broadcast %cst_225 : f32 to vector<8x128xf32>
      %376 = arith.mulf %375, %374 : vector<8x128xf32>
      %377 = vector.broadcast %362 : f32 to vector<8x128xf32>
      %378 = arith.subf %139, %377 : vector<8x128xf32>
      %379 = math.absf %378 : vector<8x128xf32>
      %cst_226 = arith.constant 1.000000e+00 : f32
      %380 = vector.broadcast %cst_226 : f32 to vector<8x128xf32>
      %381 = arith.subf %380, %379 : vector<8x128xf32>
      %cst_227 = arith.constant 0.000000e+00 : f32
      %382 = vector.broadcast %cst_227 : f32 to vector<8x128xf32>
      %383 = arith.maximumf %382, %381 : vector<8x128xf32>
      %384 = arith.mulf %376, %383 : vector<8x128xf32>
      %385 = arith.addf %arg7, %384 : vector<8x128xf32>
      %386 = vector.broadcast %362 : f32 to vector<8x128xf32>
      %387 = arith.subf %146, %386 : vector<8x128xf32>
      %388 = math.absf %387 : vector<8x128xf32>
      %cst_228 = arith.constant 1.000000e+00 : f32
      %389 = vector.broadcast %cst_228 : f32 to vector<8x128xf32>
      %390 = arith.subf %389, %388 : vector<8x128xf32>
      %cst_229 = arith.constant 0.000000e+00 : f32
      %391 = vector.broadcast %cst_229 : f32 to vector<8x128xf32>
      %392 = arith.maximumf %391, %390 : vector<8x128xf32>
      %393 = arith.mulf %376, %392 : vector<8x128xf32>
      %394 = arith.addf %arg8, %393 : vector<8x128xf32>
      %395 = vector.broadcast %362 : f32 to vector<8x128xf32>
      %396 = arith.subf %153, %395 : vector<8x128xf32>
      %397 = math.absf %396 : vector<8x128xf32>
      %cst_230 = arith.constant 1.000000e+00 : f32
      %398 = vector.broadcast %cst_230 : f32 to vector<8x128xf32>
      %399 = arith.subf %398, %397 : vector<8x128xf32>
      %cst_231 = arith.constant 0.000000e+00 : f32
      %400 = vector.broadcast %cst_231 : f32 to vector<8x128xf32>
      %401 = arith.maximumf %400, %399 : vector<8x128xf32>
      %402 = arith.mulf %376, %401 : vector<8x128xf32>
      %403 = arith.addf %arg9, %402 : vector<8x128xf32>
      %404 = vector.broadcast %362 : f32 to vector<8x128xf32>
      %405 = arith.subf %160, %404 : vector<8x128xf32>
      %406 = math.absf %405 : vector<8x128xf32>
      %cst_232 = arith.constant 1.000000e+00 : f32
      %407 = vector.broadcast %cst_232 : f32 to vector<8x128xf32>
      %408 = arith.subf %407, %406 : vector<8x128xf32>
      %cst_233 = arith.constant 0.000000e+00 : f32
      %409 = vector.broadcast %cst_233 : f32 to vector<8x128xf32>
      %410 = arith.maximumf %409, %408 : vector<8x128xf32>
      %411 = arith.mulf %376, %410 : vector<8x128xf32>
      %412 = arith.addf %arg10, %411 : vector<8x128xf32>
      %413 = vector.broadcast %362 : f32 to vector<8x128xf32>
      %414 = arith.subf %167, %413 : vector<8x128xf32>
      %415 = math.absf %414 : vector<8x128xf32>
      %cst_234 = arith.constant 1.000000e+00 : f32
      %416 = vector.broadcast %cst_234 : f32 to vector<8x128xf32>
      %417 = arith.subf %416, %415 : vector<8x128xf32>
      %cst_235 = arith.constant 0.000000e+00 : f32
      %418 = vector.broadcast %cst_235 : f32 to vector<8x128xf32>
      %419 = arith.maximumf %418, %417 : vector<8x128xf32>
      %420 = arith.mulf %376, %419 : vector<8x128xf32>
      %421 = arith.addf %arg11, %420 : vector<8x128xf32>
      %422 = vector.broadcast %362 : f32 to vector<8x128xf32>
      %423 = arith.subf %174, %422 : vector<8x128xf32>
      %424 = math.absf %423 : vector<8x128xf32>
      %cst_236 = arith.constant 1.000000e+00 : f32
      %425 = vector.broadcast %cst_236 : f32 to vector<8x128xf32>
      %426 = arith.subf %425, %424 : vector<8x128xf32>
      %cst_237 = arith.constant 0.000000e+00 : f32
      %427 = vector.broadcast %cst_237 : f32 to vector<8x128xf32>
      %428 = arith.maximumf %427, %426 : vector<8x128xf32>
      %429 = arith.mulf %376, %428 : vector<8x128xf32>
      %430 = arith.addf %arg12, %429 : vector<8x128xf32>
      %431 = vector.broadcast %362 : f32 to vector<8x128xf32>
      %432 = arith.subf %181, %431 : vector<8x128xf32>
      %433 = math.absf %432 : vector<8x128xf32>
      %cst_238 = arith.constant 1.000000e+00 : f32
      %434 = vector.broadcast %cst_238 : f32 to vector<8x128xf32>
      %435 = arith.subf %434, %433 : vector<8x128xf32>
      %cst_239 = arith.constant 0.000000e+00 : f32
      %436 = vector.broadcast %cst_239 : f32 to vector<8x128xf32>
      %437 = arith.maximumf %436, %435 : vector<8x128xf32>
      %438 = arith.mulf %376, %437 : vector<8x128xf32>
      %439 = arith.addf %arg13, %438 : vector<8x128xf32>
      %440 = vector.broadcast %362 : f32 to vector<8x128xf32>
      %441 = arith.subf %188, %440 : vector<8x128xf32>
      %442 = math.absf %441 : vector<8x128xf32>
      %cst_240 = arith.constant 1.000000e+00 : f32
      %443 = vector.broadcast %cst_240 : f32 to vector<8x128xf32>
      %444 = arith.subf %443, %442 : vector<8x128xf32>
      %cst_241 = arith.constant 0.000000e+00 : f32
      %445 = vector.broadcast %cst_241 : f32 to vector<8x128xf32>
      %446 = arith.maximumf %445, %444 : vector<8x128xf32>
      %447 = arith.mulf %376, %446 : vector<8x128xf32>
      %448 = arith.addf %arg14, %447 : vector<8x128xf32>
      %449 = vector.broadcast %362 : f32 to vector<8x128xf32>
      %450 = arith.subf %195, %449 : vector<8x128xf32>
      %451 = math.absf %450 : vector<8x128xf32>
      %cst_242 = arith.constant 1.000000e+00 : f32
      %452 = vector.broadcast %cst_242 : f32 to vector<8x128xf32>
      %453 = arith.subf %452, %451 : vector<8x128xf32>
      %cst_243 = arith.constant 0.000000e+00 : f32
      %454 = vector.broadcast %cst_243 : f32 to vector<8x128xf32>
      %455 = arith.maximumf %454, %453 : vector<8x128xf32>
      %456 = arith.mulf %376, %455 : vector<8x128xf32>
      %457 = arith.addf %arg15, %456 : vector<8x128xf32>
      scf.yield %385, %394, %403, %412, %421, %430, %439, %448, %457 : vector<8x128xf32>, vector<8x128xf32>, vector<8x128xf32>, vector<8x128xf32>, vector<8x128xf32>, vector<8x128xf32>, vector<8x128xf32>, vector<8x128xf32>, vector<8x128xf32>
    }
    %c0_118 = arith.constant 0 : index
    %c9 = arith.constant 9 : index
    %c0_119 = arith.constant 0 : index
    %c0_120 = arith.constant 0 : index
    %216 = vector.load %arg5[%c0_118, %c9, %c0_119, %c0_120] : memref<1x27x8x128xf32, #tpu.memory_space<vmem>>, vector<1x1x8x128xf32>
    %217 = vector.shape_cast %216 : vector<1x1x8x128xf32> to vector<8x128xf32>
    %218 = vector.shape_cast %215#0 : vector<8x128xf32> to vector<1x1x8x128xf32>
    tpu.vector_store %arg5[%c0_118, %c9, %c0_119, %c0_120], %218 {strides = array<i32>} : memref<1x27x8x128xf32, #tpu.memory_space<vmem>>, vector<1x1x8x128xf32>,
    %c0_121 = arith.constant 0 : index
    %c10 = arith.constant 10 : index
    %c0_122 = arith.constant 0 : index
    %c0_123 = arith.constant 0 : index
    %219 = vector.load %arg5[%c0_121, %c10, %c0_122, %c0_123] : memref<1x27x8x128xf32, #tpu.memory_space<vmem>>, vector<1x1x8x128xf32>
    %220 = vector.shape_cast %219 : vector<1x1x8x128xf32> to vector<8x128xf32>
    %221 = vector.shape_cast %215#1 : vector<8x128xf32> to vector<1x1x8x128xf32>
    tpu.vector_store %arg5[%c0_121, %c10, %c0_122, %c0_123], %221 {strides = array<i32>} : memref<1x27x8x128xf32, #tpu.memory_space<vmem>>, vector<1x1x8x128xf32>,
    %c0_124 = arith.constant 0 : index
    %c11 = arith.constant 11 : index
    %c0_125 = arith.constant 0 : index
    %c0_126 = arith.constant 0 : index
    %222 = vector.load %arg5[%c0_124, %c11, %c0_125, %c0_126] : memref<1x27x8x128xf32, #tpu.memory_space<vmem>>, vector<1x1x8x128xf32>
    %223 = vector.shape_cast %222 : vector<1x1x8x128xf32> to vector<8x128xf32>
    %224 = vector.shape_cast %215#2 : vector<8x128xf32> to vector<1x1x8x128xf32>
    tpu.vector_store %arg5[%c0_124, %c11, %c0_125, %c0_126], %224 {strides = array<i32>} : memref<1x27x8x128xf32, #tpu.memory_space<vmem>>, vector<1x1x8x128xf32>,
    %c0_127 = arith.constant 0 : index
    %c12 = arith.constant 12 : index
    %c0_128 = arith.constant 0 : index
    %c0_129 = arith.constant 0 : index
    %225 = vector.load %arg5[%c0_127, %c12, %c0_128, %c0_129] : memref<1x27x8x128xf32, #tpu.memory_space<vmem>>, vector<1x1x8x128xf32>
    %226 = vector.shape_cast %225 : vector<1x1x8x128xf32> to vector<8x128xf32>
    %227 = vector.shape_cast %215#3 : vector<8x128xf32> to vector<1x1x8x128xf32>
    tpu.vector_store %arg5[%c0_127, %c12, %c0_128, %c0_129], %227 {strides = array<i32>} : memref<1x27x8x128xf32, #tpu.memory_space<vmem>>, vector<1x1x8x128xf32>,
    %c0_130 = arith.constant 0 : index
    %c13 = arith.constant 13 : index
    %c0_131 = arith.constant 0 : index
    %c0_132 = arith.constant 0 : index
    %228 = vector.load %arg5[%c0_130, %c13, %c0_131, %c0_132] : memref<1x27x8x128xf32, #tpu.memory_space<vmem>>, vector<1x1x8x128xf32>
    %229 = vector.shape_cast %228 : vector<1x1x8x128xf32> to vector<8x128xf32>
    %230 = vector.shape_cast %215#4 : vector<8x128xf32> to vector<1x1x8x128xf32>
    tpu.vector_store %arg5[%c0_130, %c13, %c0_131, %c0_132], %230 {strides = array<i32>} : memref<1x27x8x128xf32, #tpu.memory_space<vmem>>, vector<1x1x8x128xf32>,
    %c0_133 = arith.constant 0 : index
    %c14 = arith.constant 14 : index
    %c0_134 = arith.constant 0 : index
    %c0_135 = arith.constant 0 : index
    %231 = vector.load %arg5[%c0_133, %c14, %c0_134, %c0_135] : memref<1x27x8x128xf32, #tpu.memory_space<vmem>>, vector<1x1x8x128xf32>
    %232 = vector.shape_cast %231 : vector<1x1x8x128xf32> to vector<8x128xf32>
    %233 = vector.shape_cast %215#5 : vector<8x128xf32> to vector<1x1x8x128xf32>
    tpu.vector_store %arg5[%c0_133, %c14, %c0_134, %c0_135], %233 {strides = array<i32>} : memref<1x27x8x128xf32, #tpu.memory_space<vmem>>, vector<1x1x8x128xf32>,
    %c0_136 = arith.constant 0 : index
    %c15 = arith.constant 15 : index
    %c0_137 = arith.constant 0 : index
    %c0_138 = arith.constant 0 : index
    %234 = vector.load %arg5[%c0_136, %c15, %c0_137, %c0_138] : memref<1x27x8x128xf32, #tpu.memory_space<vmem>>, vector<1x1x8x128xf32>
    %235 = vector.shape_cast %234 : vector<1x1x8x128xf32> to vector<8x128xf32>
    %236 = vector.shape_cast %215#6 : vector<8x128xf32> to vector<1x1x8x128xf32>
    tpu.vector_store %arg5[%c0_136, %c15, %c0_137, %c0_138], %236 {strides = array<i32>} : memref<1x27x8x128xf32, #tpu.memory_space<vmem>>, vector<1x1x8x128xf32>,
    %c0_139 = arith.constant 0 : index
    %c16 = arith.constant 16 : index
    %c0_140 = arith.constant 0 : index
    %c0_141 = arith.constant 0 : index
    %237 = vector.load %arg5[%c0_139, %c16, %c0_140, %c0_141] : memref<1x27x8x128xf32, #tpu.memory_space<vmem>>, vector<1x1x8x128xf32>
    %238 = vector.shape_cast %237 : vector<1x1x8x128xf32> to vector<8x128xf32>
    %239 = vector.shape_cast %215#7 : vector<8x128xf32> to vector<1x1x8x128xf32>
    tpu.vector_store %arg5[%c0_139, %c16, %c0_140, %c0_141], %239 {strides = array<i32>} : memref<1x27x8x128xf32, #tpu.memory_space<vmem>>, vector<1x1x8x128xf32>,
    %c0_142 = arith.constant 0 : index
    %c17 = arith.constant 17 : index
    %c0_143 = arith.constant 0 : index
    %c0_144 = arith.constant 0 : index
    %240 = vector.load %arg5[%c0_142, %c17, %c0_143, %c0_144] : memref<1x27x8x128xf32, #tpu.memory_space<vmem>>, vector<1x1x8x128xf32>
    %241 = vector.shape_cast %240 : vector<1x1x8x128xf32> to vector<8x128xf32>
    %242 = vector.shape_cast %215#8 : vector<8x128xf32> to vector<1x1x8x128xf32>
    tpu.vector_store %arg5[%c0_142, %c17, %c0_143, %c0_144], %242 {strides = array<i32>} : memref<1x27x8x128xf32, #tpu.memory_space<vmem>>, vector<1x1x8x128xf32>,
    %cst_145 = arith.constant 2.500000e-01 : f32
    %243 = vector.broadcast %cst_145 : f32 to vector<8x128xf32>
    %244 = arith.mulf %4, %243 : vector<8x128xf32>
    %cst_146 = arith.constant 4.000000e+00 : f32
    %245 = vector.broadcast %cst_146 : f32 to vector<8x128xf32>
    %246 = arith.subf %244, %245 : vector<8x128xf32>
    %cst_147 = arith.constant 4.000000e+00 : f32
    %247 = vector.broadcast %cst_147 : f32 to vector<8x128xf32>
    %248 = arith.addf %244, %247 : vector<8x128xf32>
    %249 = arith.subf %248, %246 : vector<8x128xf32>
    %cst_148 = arith.constant 8.000000e+00 : f32
    %250 = vector.broadcast %cst_148 : f32 to vector<8x128xf32>
    %251 = arith.divf %249, %250 : vector<8x128xf32>
    %cst_149 = arith.constant 0.000000e+00 : f32
    %252 = vector.broadcast %cst_149 : f32 to vector<8x128xf32>
    %253 = arith.mulf %252, %251 : vector<8x128xf32>
    %254 = arith.addf %246, %253 : vector<8x128xf32>
    %cst_150 = arith.constant 0.000000e+00 : f32
    %cst_151 = arith.constant 3.000000e+00 : f32
    %255 = vector.broadcast %cst_150 : f32 to vector<8x128xf32>
    %256 = arith.maximumf %255, %254 : vector<8x128xf32>
    %257 = vector.broadcast %cst_151 : f32 to vector<8x128xf32>
    %258 = arith.minimumf %257, %256 : vector<8x128xf32>
    %cst_152 = arith.constant 1.000000e+00 : f32
    %259 = vector.broadcast %cst_152 : f32 to vector<8x128xf32>
    %260 = arith.mulf %259, %251 : vector<8x128xf32>
    %261 = arith.addf %246, %260 : vector<8x128xf32>
    %cst_153 = arith.constant 0.000000e+00 : f32
    %cst_154 = arith.constant 3.000000e+00 : f32
    %262 = vector.broadcast %cst_153 : f32 to vector<8x128xf32>
    %263 = arith.maximumf %262, %261 : vector<8x128xf32>
    %264 = vector.broadcast %cst_154 : f32 to vector<8x128xf32>
    %265 = arith.minimumf %264, %263 : vector<8x128xf32>
    %cst_155 = arith.constant 2.000000e+00 : f32
    %266 = vector.broadcast %cst_155 : f32 to vector<8x128xf32>
    %267 = arith.mulf %266, %251 : vector<8x128xf32>
    %268 = arith.addf %246, %267 : vector<8x128xf32>
    %cst_156 = arith.constant 0.000000e+00 : f32
    %cst_157 = arith.constant 3.000000e+00 : f32
    %269 = vector.broadcast %cst_156 : f32 to vector<8x128xf32>
    %270 = arith.maximumf %269, %268 : vector<8x128xf32>
    %271 = vector.broadcast %cst_157 : f32 to vector<8x128xf32>
    %272 = arith.minimumf %271, %270 : vector<8x128xf32>
    %cst_158 = arith.constant 3.000000e+00 : f32
    %273 = vector.broadcast %cst_158 : f32 to vector<8x128xf32>
    %274 = arith.mulf %273, %251 : vector<8x128xf32>
    %275 = arith.addf %246, %274 : vector<8x128xf32>
    %cst_159 = arith.constant 0.000000e+00 : f32
    %cst_160 = arith.constant 3.000000e+00 : f32
    %276 = vector.broadcast %cst_159 : f32 to vector<8x128xf32>
    %277 = arith.maximumf %276, %275 : vector<8x128xf32>
    %278 = vector.broadcast %cst_160 : f32 to vector<8x128xf32>
    %279 = arith.minimumf %278, %277 : vector<8x128xf32>
    %cst_161 = arith.constant 4.000000e+00 : f32
    %280 = vector.broadcast %cst_161 : f32 to vector<8x128xf32>
    %281 = arith.mulf %280, %251 : vector<8x128xf32>
    %282 = arith.addf %246, %281 : vector<8x128xf32>
    %cst_162 = arith.constant 0.000000e+00 : f32
    %cst_163 = arith.constant 3.000000e+00 : f32
    %283 = vector.broadcast %cst_162 : f32 to vector<8x128xf32>
    %284 = arith.maximumf %283, %282 : vector<8x128xf32>
    %285 = vector.broadcast %cst_163 : f32 to vector<8x128xf32>
    %286 = arith.minimumf %285, %284 : vector<8x128xf32>
    %cst_164 = arith.constant 5.000000e+00 : f32
    %287 = vector.broadcast %cst_164 : f32 to vector<8x128xf32>
    %288 = arith.mulf %287, %251 : vector<8x128xf32>
    %289 = arith.addf %246, %288 : vector<8x128xf32>
    %cst_165 = arith.constant 0.000000e+00 : f32
    %cst_166 = arith.constant 3.000000e+00 : f32
    %290 = vector.broadcast %cst_165 : f32 to vector<8x128xf32>
    %291 = arith.maximumf %290, %289 : vector<8x128xf32>
    %292 = vector.broadcast %cst_166 : f32 to vector<8x128xf32>
    %293 = arith.minimumf %292, %291 : vector<8x128xf32>
    %cst_167 = arith.constant 6.000000e+00 : f32
    %294 = vector.broadcast %cst_167 : f32 to vector<8x128xf32>
    %295 = arith.mulf %294, %251 : vector<8x128xf32>
    %296 = arith.addf %246, %295 : vector<8x128xf32>
    %cst_168 = arith.constant 0.000000e+00 : f32
    %cst_169 = arith.constant 3.000000e+00 : f32
    %297 = vector.broadcast %cst_168 : f32 to vector<8x128xf32>
    %298 = arith.maximumf %297, %296 : vector<8x128xf32>
    %299 = vector.broadcast %cst_169 : f32 to vector<8x128xf32>
    %300 = arith.minimumf %299, %298 : vector<8x128xf32>
    %cst_170 = arith.constant 7.000000e+00 : f32
    %301 = vector.broadcast %cst_170 : f32 to vector<8x128xf32>
    %302 = arith.mulf %301, %251 : vector<8x128xf32>
    %303 = arith.addf %246, %302 : vector<8x128xf32>
    %cst_171 = arith.constant 0.000000e+00 : f32
    %cst_172 = arith.constant 3.000000e+00 : f32
    %304 = vector.broadcast %cst_171 : f32 to vector<8x128xf32>
    %305 = arith.maximumf %304, %303 : vector<8x128xf32>
    %306 = vector.broadcast %cst_172 : f32 to vector<8x128xf32>
    %307 = arith.minimumf %306, %305 : vector<8x128xf32>
    %cst_173 = arith.constant 8.000000e+00 : f32
    %308 = vector.broadcast %cst_173 : f32 to vector<8x128xf32>
    %309 = arith.mulf %308, %251 : vector<8x128xf32>
    %310 = arith.addf %246, %309 : vector<8x128xf32>
    %cst_174 = arith.constant 0.000000e+00 : f32
    %cst_175 = arith.constant 3.000000e+00 : f32
    %311 = vector.broadcast %cst_174 : f32 to vector<8x128xf32>
    %312 = arith.maximumf %311, %310 : vector<8x128xf32>
    %313 = vector.broadcast %cst_175 : f32 to vector<8x128xf32>
    %314 = arith.minimumf %313, %312 : vector<8x128xf32>
    %c4_i32 = arith.constant 4 : i32
    %315 = arith.addi %2, %c4_i32 : i32
    %316 = arith.index_cast %315 : i32 to index
    %317 = memref.load %arg2[%316] : memref<12xi32, #tpu.memory_space<smem>>
    %c4_i32_176 = arith.constant 4 : i32
    %318 = arith.addi %2, %c4_i32_176 : i32
    %c1_i32_177 = arith.constant 1 : i32
    %319 = arith.addi %318, %c1_i32_177 : i32
    %320 = arith.index_cast %319 : i32 to index
    %321 = memref.load %arg2[%320] : memref<12xi32, #tpu.memory_space<smem>>
    %cst_178 = arith.constant 0.000000e+00 : f32
    %322 = vector.broadcast %cst_178 : f32 to vector<8x128xf32>
    %cst_179 = arith.constant 0.000000e+00 : f32
    %323 = vector.broadcast %cst_179 : f32 to vector<8x128xf32>
    %cst_180 = arith.constant 0.000000e+00 : f32
    %324 = vector.broadcast %cst_180 : f32 to vector<8x128xf32>
    %cst_181 = arith.constant 0.000000e+00 : f32
    %325 = vector.broadcast %cst_181 : f32 to vector<8x128xf32>
    %cst_182 = arith.constant 0.000000e+00 : f32
    %326 = vector.broadcast %cst_182 : f32 to vector<8x128xf32>
    %cst_183 = arith.constant 0.000000e+00 : f32
    %327 = vector.broadcast %cst_183 : f32 to vector<8x128xf32>
    %cst_184 = arith.constant 0.000000e+00 : f32
    %328 = vector.broadcast %cst_184 : f32 to vector<8x128xf32>
    %cst_185 = arith.constant 0.000000e+00 : f32
    %329 = vector.broadcast %cst_185 : f32 to vector<8x128xf32>
    %cst_186 = arith.constant 0.000000e+00 : f32
    %330 = vector.broadcast %cst_186 : f32 to vector<8x128xf32>
    %c1_i32_187 = arith.constant 1 : i32
    %331 = arith.addi %321, %c1_i32_187 : i32
    %332 = arith.subi %331, %317 : i32
    %333 = arith.addi %317, %332 : i32
    %c1_i32_188 = arith.constant 1 : i32
    %334:9 = scf.for %arg6 = %317 to %333 step %c1_i32_188 iter_args(%arg7 = %322, %arg8 = %323, %arg9 = %324, %arg10 = %325, %arg11 = %326, %arg12 = %327, %arg13 = %328, %arg14 = %329, %arg15 = %330) -> (vector<8x128xf32>, vector<8x128xf32>, vector<8x128xf32>, vector<8x128xf32>, vector<8x128xf32>, vector<8x128xf32>, vector<8x128xf32>, vector<8x128xf32>, vector<8x128xf32>)  : i32 {
      %362 = arith.sitofp %arg6 : i32 to f32
      %c2_i32_216 = arith.constant 2 : i32
      %363 = arith.muli %c2_i32_216, %arg6 : i32
      %c2_i32_217 = arith.constant 2 : i32
      %364 = arith.muli %c2_i32_217, %363 : i32
      %c0_218 = arith.constant 0 : index
      %365 = arith.index_cast %364 : i32 to index
      %c0_219 = arith.constant 0 : index
      %c0_220 = arith.constant 0 : index
      %366 = vector.load %arg4[%c0_218, %365, %c0_219, %c0_220] : memref<1x16x8x128xf32, #tpu.memory_space<vmem>>, vector<1x1x8x128xf32>
      %367 = vector.shape_cast %366 : vector<1x1x8x128xf32> to vector<1x8x128xf32>
      %368 = vector.shape_cast %367 : vector<1x8x128xf32> to vector<8x128xf32>
      %c2_i32_221 = arith.constant 2 : i32
      %369 = arith.muli %c2_i32_221, %363 : i32
      %c1_i32_222 = arith.constant 1 : i32
      %370 = arith.addi %369, %c1_i32_222 : i32
      %c0_223 = arith.constant 0 : index
      %371 = arith.index_cast %370 : i32 to index
      %c0_224 = arith.constant 0 : index
      %c0_225 = arith.constant 0 : index
      %372 = vector.load %arg4[%c0_223, %371, %c0_224, %c0_225] : memref<1x16x8x128xf32, #tpu.memory_space<vmem>>, vector<1x1x8x128xf32>
      %373 = vector.shape_cast %372 : vector<1x1x8x128xf32> to vector<1x8x128xf32>
      %374 = vector.shape_cast %373 : vector<1x8x128xf32> to vector<8x128xf32>
      %375 = arith.addf %368, %374 : vector<8x128xf32>
      %cst_226 = arith.constant 5.000000e-01 : f32
      %376 = vector.broadcast %cst_226 : f32 to vector<8x128xf32>
      %377 = arith.mulf %376, %375 : vector<8x128xf32>
      %c2_i32_227 = arith.constant 2 : i32
      %378 = arith.muli %c2_i32_227, %arg6 : i32
      %c1_i32_228 = arith.constant 1 : i32
      %379 = arith.addi %378, %c1_i32_228 : i32
      %c2_i32_229 = arith.constant 2 : i32
      %380 = arith.muli %c2_i32_229, %379 : i32
      %c0_230 = arith.constant 0 : index
      %381 = arith.index_cast %380 : i32 to index
      %c0_231 = arith.constant 0 : index
      %c0_232 = arith.constant 0 : index
      %382 = vector.load %arg4[%c0_230, %381, %c0_231, %c0_232] : memref<1x16x8x128xf32, #tpu.memory_space<vmem>>, vector<1x1x8x128xf32>
      %383 = vector.shape_cast %382 : vector<1x1x8x128xf32> to vector<1x8x128xf32>
      %384 = vector.shape_cast %383 : vector<1x8x128xf32> to vector<8x128xf32>
      %c2_i32_233 = arith.constant 2 : i32
      %385 = arith.muli %c2_i32_233, %379 : i32
      %c1_i32_234 = arith.constant 1 : i32
      %386 = arith.addi %385, %c1_i32_234 : i32
      %c0_235 = arith.constant 0 : index
      %387 = arith.index_cast %386 : i32 to index
      %c0_236 = arith.constant 0 : index
      %c0_237 = arith.constant 0 : index
      %388 = vector.load %arg4[%c0_235, %387, %c0_236, %c0_237] : memref<1x16x8x128xf32, #tpu.memory_space<vmem>>, vector<1x1x8x128xf32>
      %389 = vector.shape_cast %388 : vector<1x1x8x128xf32> to vector<1x8x128xf32>
      %390 = vector.shape_cast %389 : vector<1x8x128xf32> to vector<8x128xf32>
      %391 = arith.addf %384, %390 : vector<8x128xf32>
      %cst_238 = arith.constant 5.000000e-01 : f32
      %392 = vector.broadcast %cst_238 : f32 to vector<8x128xf32>
      %393 = arith.mulf %392, %391 : vector<8x128xf32>
      %394 = arith.addf %377, %393 : vector<8x128xf32>
      %cst_239 = arith.constant 5.000000e-01 : f32
      %395 = vector.broadcast %cst_239 : f32 to vector<8x128xf32>
      %396 = arith.mulf %395, %394 : vector<8x128xf32>
      %397 = vector.broadcast %362 : f32 to vector<8x128xf32>
      %398 = arith.subf %258, %397 : vector<8x128xf32>
      %399 = math.absf %398 : vector<8x128xf32>
      %cst_240 = arith.constant 1.000000e+00 : f32
      %400 = vector.broadcast %cst_240 : f32 to vector<8x128xf32>
      %401 = arith.subf %400, %399 : vector<8x128xf32>
      %cst_241 = arith.constant 0.000000e+00 : f32
      %402 = vector.broadcast %cst_241 : f32 to vector<8x128xf32>
      %403 = arith.maximumf %402, %401 : vector<8x128xf32>
      %404 = arith.mulf %396, %403 : vector<8x128xf32>
      %405 = arith.addf %arg7, %404 : vector<8x128xf32>
      %406 = vector.broadcast %362 : f32 to vector<8x128xf32>
      %407 = arith.subf %265, %406 : vector<8x128xf32>
      %408 = math.absf %407 : vector<8x128xf32>
      %cst_242 = arith.constant 1.000000e+00 : f32
      %409 = vector.broadcast %cst_242 : f32 to vector<8x128xf32>
      %410 = arith.subf %409, %408 : vector<8x128xf32>
      %cst_243 = arith.constant 0.000000e+00 : f32
      %411 = vector.broadcast %cst_243 : f32 to vector<8x128xf32>
      %412 = arith.maximumf %411, %410 : vector<8x128xf32>
      %413 = arith.mulf %396, %412 : vector<8x128xf32>
      %414 = arith.addf %arg8, %413 : vector<8x128xf32>
      %415 = vector.broadcast %362 : f32 to vector<8x128xf32>
      %416 = arith.subf %272, %415 : vector<8x128xf32>
      %417 = math.absf %416 : vector<8x128xf32>
      %cst_244 = arith.constant 1.000000e+00 : f32
      %418 = vector.broadcast %cst_244 : f32 to vector<8x128xf32>
      %419 = arith.subf %418, %417 : vector<8x128xf32>
      %cst_245 = arith.constant 0.000000e+00 : f32
      %420 = vector.broadcast %cst_245 : f32 to vector<8x128xf32>
      %421 = arith.maximumf %420, %419 : vector<8x128xf32>
      %422 = arith.mulf %396, %421 : vector<8x128xf32>
      %423 = arith.addf %arg9, %422 : vector<8x128xf32>
      %424 = vector.broadcast %362 : f32 to vector<8x128xf32>
      %425 = arith.subf %279, %424 : vector<8x128xf32>
      %426 = math.absf %425 : vector<8x128xf32>
      %cst_246 = arith.constant 1.000000e+00 : f32
      %427 = vector.broadcast %cst_246 : f32 to vector<8x128xf32>
      %428 = arith.subf %427, %426 : vector<8x128xf32>
      %cst_247 = arith.constant 0.000000e+00 : f32
      %429 = vector.broadcast %cst_247 : f32 to vector<8x128xf32>
      %430 = arith.maximumf %429, %428 : vector<8x128xf32>
      %431 = arith.mulf %396, %430 : vector<8x128xf32>
      %432 = arith.addf %arg10, %431 : vector<8x128xf32>
      %433 = vector.broadcast %362 : f32 to vector<8x128xf32>
      %434 = arith.subf %286, %433 : vector<8x128xf32>
      %435 = math.absf %434 : vector<8x128xf32>
      %cst_248 = arith.constant 1.000000e+00 : f32
      %436 = vector.broadcast %cst_248 : f32 to vector<8x128xf32>
      %437 = arith.subf %436, %435 : vector<8x128xf32>
      %cst_249 = arith.constant 0.000000e+00 : f32
      %438 = vector.broadcast %cst_249 : f32 to vector<8x128xf32>
      %439 = arith.maximumf %438, %437 : vector<8x128xf32>
      %440 = arith.mulf %396, %439 : vector<8x128xf32>
      %441 = arith.addf %arg11, %440 : vector<8x128xf32>
      %442 = vector.broadcast %362 : f32 to vector<8x128xf32>
      %443 = arith.subf %293, %442 : vector<8x128xf32>
      %444 = math.absf %443 : vector<8x128xf32>
      %cst_250 = arith.constant 1.000000e+00 : f32
      %445 = vector.broadcast %cst_250 : f32 to vector<8x128xf32>
      %446 = arith.subf %445, %444 : vector<8x128xf32>
      %cst_251 = arith.constant 0.000000e+00 : f32
      %447 = vector.broadcast %cst_251 : f32 to vector<8x128xf32>
      %448 = arith.maximumf %447, %446 : vector<8x128xf32>
      %449 = arith.mulf %396, %448 : vector<8x128xf32>
      %450 = arith.addf %arg12, %449 : vector<8x128xf32>
      %451 = vector.broadcast %362 : f32 to vector<8x128xf32>
      %452 = arith.subf %300, %451 : vector<8x128xf32>
      %453 = math.absf %452 : vector<8x128xf32>
      %cst_252 = arith.constant 1.000000e+00 : f32
      %454 = vector.broadcast %cst_252 : f32 to vector<8x128xf32>
      %455 = arith.subf %454, %453 : vector<8x128xf32>
      %cst_253 = arith.constant 0.000000e+00 : f32
      %456 = vector.broadcast %cst_253 : f32 to vector<8x128xf32>
      %457 = arith.maximumf %456, %455 : vector<8x128xf32>
      %458 = arith.mulf %396, %457 : vector<8x128xf32>
      %459 = arith.addf %arg13, %458 : vector<8x128xf32>
      %460 = vector.broadcast %362 : f32 to vector<8x128xf32>
      %461 = arith.subf %307, %460 : vector<8x128xf32>
      %462 = math.absf %461 : vector<8x128xf32>
      %cst_254 = arith.constant 1.000000e+00 : f32
      %463 = vector.broadcast %cst_254 : f32 to vector<8x128xf32>
      %464 = arith.subf %463, %462 : vector<8x128xf32>
      %cst_255 = arith.constant 0.000000e+00 : f32
      %465 = vector.broadcast %cst_255 : f32 to vector<8x128xf32>
      %466 = arith.maximumf %465, %464 : vector<8x128xf32>
      %467 = arith.mulf %396, %466 : vector<8x128xf32>
      %468 = arith.addf %arg14, %467 : vector<8x128xf32>
      %469 = vector.broadcast %362 : f32 to vector<8x128xf32>
      %470 = arith.subf %314, %469 : vector<8x128xf32>
      %471 = math.absf %470 : vector<8x128xf32>
      %cst_256 = arith.constant 1.000000e+00 : f32
      %472 = vector.broadcast %cst_256 : f32 to vector<8x128xf32>
      %473 = arith.subf %472, %471 : vector<8x128xf32>
      %cst_257 = arith.constant 0.000000e+00 : f32
      %474 = vector.broadcast %cst_257 : f32 to vector<8x128xf32>
      %475 = arith.maximumf %474, %473 : vector<8x128xf32>
      %476 = arith.mulf %396, %475 : vector<8x128xf32>
      %477 = arith.addf %arg15, %476 : vector<8x128xf32>
      scf.yield %405, %414, %423, %432, %441, %450, %459, %468, %477 : vector<8x128xf32>, vector<8x128xf32>, vector<8x128xf32>, vector<8x128xf32>, vector<8x128xf32>, vector<8x128xf32>, vector<8x128xf32>, vector<8x128xf32>, vector<8x128xf32>
    }
    %c0_189 = arith.constant 0 : index
    %c18 = arith.constant 18 : index
    %c0_190 = arith.constant 0 : index
    %c0_191 = arith.constant 0 : index
    %335 = vector.load %arg5[%c0_189, %c18, %c0_190, %c0_191] : memref<1x27x8x128xf32, #tpu.memory_space<vmem>>, vector<1x1x8x128xf32>
    %336 = vector.shape_cast %335 : vector<1x1x8x128xf32> to vector<8x128xf32>
    %337 = vector.shape_cast %334#0 : vector<8x128xf32> to vector<1x1x8x128xf32>
    tpu.vector_store %arg5[%c0_189, %c18, %c0_190, %c0_191], %337 {strides = array<i32>} : memref<1x27x8x128xf32, #tpu.memory_space<vmem>>, vector<1x1x8x128xf32>,
    %c0_192 = arith.constant 0 : index
    %c19 = arith.constant 19 : index
    %c0_193 = arith.constant 0 : index
    %c0_194 = arith.constant 0 : index
    %338 = vector.load %arg5[%c0_192, %c19, %c0_193, %c0_194] : memref<1x27x8x128xf32, #tpu.memory_space<vmem>>, vector<1x1x8x128xf32>
    %339 = vector.shape_cast %338 : vector<1x1x8x128xf32> to vector<8x128xf32>
    %340 = vector.shape_cast %334#1 : vector<8x128xf32> to vector<1x1x8x128xf32>
    tpu.vector_store %arg5[%c0_192, %c19, %c0_193, %c0_194], %340 {strides = array<i32>} : memref<1x27x8x128xf32, #tpu.memory_space<vmem>>, vector<1x1x8x128xf32>,
    %c0_195 = arith.constant 0 : index
    %c20 = arith.constant 20 : index
    %c0_196 = arith.constant 0 : index
    %c0_197 = arith.constant 0 : index
    %341 = vector.load %arg5[%c0_195, %c20, %c0_196, %c0_197] : memref<1x27x8x128xf32, #tpu.memory_space<vmem>>, vector<1x1x8x128xf32>
    %342 = vector.shape_cast %341 : vector<1x1x8x128xf32> to vector<8x128xf32>
    %343 = vector.shape_cast %334#2 : vector<8x128xf32> to vector<1x1x8x128xf32>
    tpu.vector_store %arg5[%c0_195, %c20, %c0_196, %c0_197], %343 {strides = array<i32>} : memref<1x27x8x128xf32, #tpu.memory_space<vmem>>, vector<1x1x8x128xf32>,
    %c0_198 = arith.constant 0 : index
    %c21 = arith.constant 21 : index
    %c0_199 = arith.constant 0 : index
    %c0_200 = arith.constant 0 : index
    %344 = vector.load %arg5[%c0_198, %c21, %c0_199, %c0_200] : memref<1x27x8x128xf32, #tpu.memory_space<vmem>>, vector<1x1x8x128xf32>
    %345 = vector.shape_cast %344 : vector<1x1x8x128xf32> to vector<8x128xf32>
    %346 = vector.shape_cast %334#3 : vector<8x128xf32> to vector<1x1x8x128xf32>
    tpu.vector_store %arg5[%c0_198, %c21, %c0_199, %c0_200], %346 {strides = array<i32>} : memref<1x27x8x128xf32, #tpu.memory_space<vmem>>, vector<1x1x8x128xf32>,
    %c0_201 = arith.constant 0 : index
    %c22 = arith.constant 22 : index
    %c0_202 = arith.constant 0 : index
    %c0_203 = arith.constant 0 : index
    %347 = vector.load %arg5[%c0_201, %c22, %c0_202, %c0_203] : memref<1x27x8x128xf32, #tpu.memory_space<vmem>>, vector<1x1x8x128xf32>
    %348 = vector.shape_cast %347 : vector<1x1x8x128xf32> to vector<8x128xf32>
    %349 = vector.shape_cast %334#4 : vector<8x128xf32> to vector<1x1x8x128xf32>
    tpu.vector_store %arg5[%c0_201, %c22, %c0_202, %c0_203], %349 {strides = array<i32>} : memref<1x27x8x128xf32, #tpu.memory_space<vmem>>, vector<1x1x8x128xf32>,
    %c0_204 = arith.constant 0 : index
    %c23 = arith.constant 23 : index
    %c0_205 = arith.constant 0 : index
    %c0_206 = arith.constant 0 : index
    %350 = vector.load %arg5[%c0_204, %c23, %c0_205, %c0_206] : memref<1x27x8x128xf32, #tpu.memory_space<vmem>>, vector<1x1x8x128xf32>
    %351 = vector.shape_cast %350 : vector<1x1x8x128xf32> to vector<8x128xf32>
    %352 = vector.shape_cast %334#5 : vector<8x128xf32> to vector<1x1x8x128xf32>
    tpu.vector_store %arg5[%c0_204, %c23, %c0_205, %c0_206], %352 {strides = array<i32>} : memref<1x27x8x128xf32, #tpu.memory_space<vmem>>, vector<1x1x8x128xf32>,
    %c0_207 = arith.constant 0 : index
    %c24 = arith.constant 24 : index
    %c0_208 = arith.constant 0 : index
    %c0_209 = arith.constant 0 : index
    %353 = vector.load %arg5[%c0_207, %c24, %c0_208, %c0_209] : memref<1x27x8x128xf32, #tpu.memory_space<vmem>>, vector<1x1x8x128xf32>
    %354 = vector.shape_cast %353 : vector<1x1x8x128xf32> to vector<8x128xf32>
    %355 = vector.shape_cast %334#6 : vector<8x128xf32> to vector<1x1x8x128xf32>
    tpu.vector_store %arg5[%c0_207, %c24, %c0_208, %c0_209], %355 {strides = array<i32>} : memref<1x27x8x128xf32, #tpu.memory_space<vmem>>, vector<1x1x8x128xf32>,
    %c0_210 = arith.constant 0 : index
    %c25 = arith.constant 25 : index
    %c0_211 = arith.constant 0 : index
    %c0_212 = arith.constant 0 : index
    %356 = vector.load %arg5[%c0_210, %c25, %c0_211, %c0_212] : memref<1x27x8x128xf32, #tpu.memory_space<vmem>>, vector<1x1x8x128xf32>
    %357 = vector.shape_cast %356 : vector<1x1x8x128xf32> to vector<8x128xf32>
    %358 = vector.shape_cast %334#7 : vector<8x128xf32> to vector<1x1x8x128xf32>
    tpu.vector_store %arg5[%c0_210, %c25, %c0_211, %c0_212], %358 {strides = array<i32>} : memref<1x27x8x128xf32, #tpu.memory_space<vmem>>, vector<1x1x8x128xf32>,
    %c0_213 = arith.constant 0 : index
    %c26 = arith.constant 26 : index
    %c0_214 = arith.constant 0 : index
    %c0_215 = arith.constant 0 : index
    %359 = vector.load %arg5[%c0_213, %c26, %c0_214, %c0_215] : memref<1x27x8x128xf32, #tpu.memory_space<vmem>>, vector<1x1x8x128xf32>
    %360 = vector.shape_cast %359 : vector<1x1x8x128xf32> to vector<8x128xf32>
    %361 = vector.shape_cast %334#8 : vector<8x128xf32> to vector<1x1x8x128xf32>
    tpu.vector_store %arg5[%c0_213, %c26, %c0_214, %c0_215], %361 {strides = array<i32>} : memref<1x27x8x128xf32, #tpu.memory_space<vmem>>, vector<1x1x8x128xf32>,
    return
  }
  func.func @transform_0(%arg0: i32, %arg1: i32, %arg2: memref<12xi32, #tpu.memory_space<smem>>) -> (i32, i32, i32, i32) {
    %c0_i32 = arith.constant 0 : i32
    %c0_i32_0 = arith.constant 0 : i32
    %c0_i32_1 = arith.constant 0 : i32
    return %arg0, %c0_i32, %arg1, %c0_i32_0 : i32, i32, i32, i32
  }
  func.func @transform_1(%arg0: i32, %arg1: i32, %arg2: memref<12xi32, #tpu.memory_space<smem>>) -> (i32, i32, i32, i32) {
    %c0_i32 = arith.constant 0 : i32
    %c0_i32_0 = arith.constant 0 : i32
    %c0_i32_1 = arith.constant 0 : i32
    return %arg0, %c0_i32, %arg1, %c0_i32_0 : i32, i32, i32, i32
  }
  func.func @transform_2(%arg0: i32, %arg1: i32, %arg2: memref<12xi32, #tpu.memory_space<smem>>) -> (i32, i32, i32, i32) {
    %c0_i32 = arith.constant 0 : i32
    %c0_i32_0 = arith.constant 0 : i32
    %c0_i32_1 = arith.constant 0 : i32
    return %arg0, %c0_i32, %arg1, %c0_i32_0 : i32, i32, i32, i32
  }
}

</mosaic_0001>

<bundles_post_ra>
// kernel: tpu_custom_call.1
= control target key start
LH: loop header
LB: loop body
LE: loop exit
PB: predicated region body
PF: predicated region fallthrough
CT: control target
= control target key end

     0   :  { %s2882_s0 = inlined_call_operand.hbm [shape: s32[12], index: 0, kind: input, shape index: {}]   ;;  %s2883_s1 = inlined_call_operand.hbm [shape: f32[2,1,8,128], index: 1, kind: input, shape index: {}]   ;;  %s2884_s2 = inlined_call_operand.hbm [shape: f32[2,16,8,128], index: 2, kind: input, shape index: {}]   ;;  %s2885_s3 = inlined_call_operand.hbm [shape: f32[2,27,8,128], index: 3, kind: output, shape index: {}]  }
   0x1   :  { %s1507_s14 = scalar_lea.hbm %s2882_s0, 16 }
   0x2   :  { %p1508_p0 = scmp.ne.s32.totalorder %s2882_s0, %s1507_s14  ;;  %p1511_p1 = scmp.lt.u32.totalorder %s1507_s14, %s2882_s0 }
   0x4   :  { %p1513_p2 = pnand %p1511_p1, %p1508_p0 }
   0x6   :  { %1516 = shalt.err (!%p1513_p2)  }
   0x7   :  { %s2123_s19 = smov [#allocation3]  }
   0x8   :  { %9 = dma.hbm_to_smem %s2882_s0, 16, %s2123_s19, [#allocation2] }
   0x9   :  { %1857 = dma.done.wait [#allocation2], 16 }
   0xa   :  { %1858 = vsyncadd [#allocation2], 4294967280 }
   0xb   :  { %11 = sfence }
   0xc   :  { %12 = vsyncpa [#allocation5], 0 }
   0xd   :  { %14 = vsyncpa [#allocation5 + $0x1], 0 }
   0xe   :  { %15 = vsyncpa [#allocation8], 0 }
   0xf   :  { %17 = vsyncpa [#allocation8 + $0x1], 0 }
  0x10   :  { %18 = vsyncpa [#allocation6], 0 }
  0x11   :  { %20 = vsyncpa [#allocation6 + $0x1], 0  ;;  %s2163_s22 = smov 0   ;;  %s2165_s23 = smov 0  }
  0x12   :  { %s2167_s24 = smov 0   ;;  %s2169_s25 = smov 0  }
  0x13   :  { %s2171_s26 = smov 0   ;;  %s2173_s0 = smov 0  }
  0x14 LB: > { %s907_s27 = sadd.s32 4294967295, %s1893_s0   ;;  %s908_s28 = sadd.s32 4294967294, %s1893_s0   ;;  %s1893_s0 = sphi %s2173_s0, %s26_s0   ;;  %s1889_s26 = sphi %s2171_s26, %s2953_s26   ;;  %s1885_s25 = sphi %s2169_s25, %s2952_s25   ;;  %s1881_s24 = sphi %s2167_s24, %s2951_s24   ;;  %s1877_s23 = sphi %s2165_s23, %s2950_s23   ;;  %s1873_s22 = sphi %s2163_s22, %s2949_s22  }
  0x15   : > { %s38_s29 = sadd.s32 1, %s1889_s26  ;;  %s47_s30 = sadd.s32 1, %s1881_s24 }
  0x16   : > { %p40_p3 = scmp.ge.s32.totalorder %s38_s29, 2  ;;  %p54_p4 = scmp.ne.s32.totalorder %s1881_s24, %s1877_s23 }
  0x17   : > { %p55_p5 = scmp.eq.s32.totalorder %s1893_s0, 0  ;;  %p60_p6 = scmp.ne.s32.totalorder %s1877_s23, %s1873_s22 }
  0x18   : > { %s2955_s29 = smov (%p40_p3, %s38_s29), 0  ;;  %p61_p8 = scmp.eq.s32.totalorder %s907_s27, 0 }
  0x19   : > { %p2204_p7 = por %p55_p5, %p54_p4  ;;  %s42_s5 = ssub.s32 %s1889_s26, %s2955_s29 }
  0x1a   : > { %p114_p9 = scmp.eq.s32.totalorder %s907_s27, 1  ;;  %p45_p10 = scmp.eq.s32.totalorder %s42_s5, 0 }
  0x1b   : > { %p2210_p11 = por %p61_p8, %p60_p6  ;;  %p120_p13 = scmp.eq.s32.totalorder %s908_s28, 1 }
  0x1c   : > { %p2214_p12 = por %p114_p9, %p54_p4  ;;  %p996_p2 = scmp.lt.s32.totalorder %s1893_s0, 2 }
  0x1d   : > { %s2889_s6 = scalar_select %p2210_p11, 1, 0 }
  0x1e   : > { %s2890_s7 = scalar_select %p2214_p12, 1, 0 }
  0x1f   : > { %s2219_s8 = scalar_select %p45_p10, %s1881_s24, %s47_s30  }
  0x20   : > { %p2221_p0 = por %p120_p13, %p60_p6  ;;  %s2228_s10 = sand.u32 1, %s1881_s24  }
  0x21   : > { %s911_s11 = sshll.u32 %s2228_s10, 3  ;;  %s912_s12 = sshll.u32 %s1889_s26, 7 }
  0x22   : > { %s2891_s9 = scalar_select %p2221_p0, 1, 0 }
  0x23   : > { %s2235_s15 = scalar_lea.hbm %s2883_s1, %s912_s12  ;;  %s144_s16 = scalar_lea.vmem [#allocation4], %s911_s11 }
  0x24   : > { %s152_s17 = sshll.u32 %s144_s16, 4  ;;  %p2241_p3 = pnand %p996_p2, %p2204_p7  ;;  %s2237_s17 = int_to_ptr.vmem [resolvable:$true] %s152_s17 }
  0x25   : > { %s141_s19 = scalar_lea.sflag [#allocation5], %s2228_s10  ;;  %s1517_s20 = scalar_lea.hbm %s2235_s15, 128 }
  0x26   : > { %p1518_p6 = scmp.ne.s32.totalorder %s2235_s15, %s1517_s20  ;;  %p1519_p8 = pneg %p2241_p3 }
  0x27   : > { %s1522_s28 = scalar_lea.hbm %s2883_s1, 256  ;;  %p1523_p7 = scmp.lt.u32.totalorder %s2235_s15, %s2883_s1 }
  0x28   : > { %p1520_p9 = pnand %p1519_p8, %p1518_p6  ;;  %p1524_p13 = scmp.lt.u32.totalorder %s1522_s28, %s1517_s20 }
  0x29   : > { %p1526_p1 = scmp.lt.u32.totalorder %s1517_s20, %s2235_s15 }
  0x2a   : > { %p1521_p10 = pneg %p1520_p9  ;;  %p1525_p2 = por %p1524_p13, %p1523_p7 }
  0x2c   : > { %p1527_p4 = por %p1526_p1, %p1525_p2 }
  0x2e   : > { %p1528_p5 = pnand %p1527_p4, %p1521_p10 }
  0x30   : > { %1531 = shalt.err (!%p1528_p5)
}
  0x31   : > { %s1532_s5 = scalar_lea.vmem %s2237_s17, 128  ;;  %s2124_s11 = smov [#allocation4]  }
  0x32   : > { %p1533_p6 = scmp.ne.s32.totalorder %s2237_s17, %s1532_s5  ;;  %s1537_s12 = sshll.u32 %s2124_s11, 4  ;;  %s1538_s12 = int_to_ptr.vmem [resolvable:$false] %s1537_s12 }
  0x33   : > { %s1539_s13 = scalar_lea.vmem %s1538_s12, 256  ;;  %p1540_p12 = scmp.lt.s32.totalorder %s2237_s17, %s1538_s12 }
  0x34   : > { %p1535_p9 = pnand %p1533_p6, %p1519_p8  ;;  %p1541_p7 = scmp.lt.s32.totalorder %s1539_s13, %s1532_s5 }
  0x36   : > { %p1536_p0 = pneg %p1535_p9  ;;  %p1542_p13 = por %p1541_p7, %p1540_p12 }
  0x38   : > { %p1543_p1 = pnand %p1542_p13, %p1536_p0 }
  0x3a   : > { %1546 = shalt.err (!%p1543_p1)
}
  0x3b   : > { %988 = dma.hbm_to_vmem [thread:$0]  (!%p2241_p3), %s2235_s15, 128, %s2237_s17, %s141_s19  }
  0x3c   : > { %p2893_p4 = scmp.lt.s32.totalorder %s1893_s0, 3  ;;  %p2894_p5 = scmp.ge.s32.totalorder %s1893_s0, 1 }
  0x3d   : > { %s913_s16 = sshll.u32 %s2228_s10, 7  ;;  %s969_s20 = sshll.u32 %s1889_s26, 11 }
  0x3e   : > { %p2277_p10 = pnand %p2894_p5, %p2893_p4  ;;  %s2286_s28 = scalar_lea.hbm %s2884_s2, %s969_s20 }
  0x3f   : > { %s163_s30 = scalar_lea.vmem [#allocation7], %s913_s16  ;;  %s160_s15 = scalar_lea.sflag [#allocation8], %s2228_s10 }
  0x40   : > { %s171_s4 = sshll.u32 %s163_s30, 4  ;;  %s1547_s17 = scalar_lea.hbm %s2286_s28, 2048  ;;  %s2288_s4 = int_to_ptr.vmem [resolvable:$true] %s171_s4 }
  0x41   : > { %p1548_p12 = scmp.ne.s32.totalorder %s2286_s28, %s1547_s17  ;;  %s1552_s11 = scalar_lea.hbm %s2884_s2, 4096 }
  0x42   : > { %p1553_p6 = scmp.lt.u32.totalorder %s2286_s28, %s2884_s2  ;;  %p1554_p9 = scmp.lt.u32.totalorder %s1552_s11, %s1547_s17 }
  0x43   : > { %p1550_p0 = pnand %p1548_p12, %p1519_p8  ;;  %p1556_p13 = scmp.lt.u32.totalorder %s1547_s17, %s2286_s28 }
  0x44   : > { %p1555_p7 = por %p1554_p9, %p1553_p6 }
  0x45   : > { %p1551_p2 = pneg %p1550_p0 }
  0x46   : > { %p1557_p1 = por %p1556_p13, %p1555_p7 }
  0x48   : > { %p1558_p4 = pnand %p1557_p1, %p1551_p2 }
  0x4a   : > { %1561 = shalt.err (!%p1558_p4)
}
  0x4b   : > { %s1562_s16 = scalar_lea.vmem %s2288_s4, 2048  ;;  %s2125_s20 = smov [#allocation7]  }
  0x4c   : > { %p1563_p5 = scmp.ne.s32.totalorder %s2288_s4, %s1562_s16  ;;  %s1567_s21 = sshll.u32 %s2125_s20, 4  ;;  %s1568_s21 = int_to_ptr.vmem [resolvable:$false] %s1567_s21 }
  0x4d   : > { %s1569_s27 = scalar_lea.vmem %s1568_s21, 4096  ;;  %p1570_p11 = scmp.lt.s32.totalorder %s2288_s4, %s1568_s21 }
  0x4e   : > { %p1565_p12 = pnand %p1563_p5, %p1519_p8  ;;  %p1571_p6 = scmp.lt.s32.totalorder %s1569_s27, %s1562_s16 }
  0x50   : > { %p1566_p0 = pneg %p1565_p12  ;;  %p1572_p9 = por %p1571_p6, %p1570_p11 }
  0x52   : > { %p1573_p7 = pnand %p1572_p9, %p1566_p0 }
  0x54   : > { %1576 = shalt.err (!%p1573_p7)
}
  0x55   : > { %s2126_s30 = smov 128   ;;  %s2127_s17 = smov 8  }
  0x56   : > { %991 = dma.hbm_to_vmem [thread:$0]  (!%p2241_p3), %s2286_s28, 2048, %s2288_s4, %s160_s15, %s2126_s30, %s2126_s30, %s2127_s17  }
  0x57   : > { %183 = sbr.rel (%p2277_p10) target bundleno = 265 (0x109), region = 28  ;;  %s2319_s19 = sand.u32 (!%p2277_p10), 1, %s1877_s23  }
  0x58   : > { %s917_s5 = sshll.u32 (!%p2277_p10), %s2319_s19, 3  ;;  %s186_s11 = scalar_lea.sflag (!%p2277_p10), [#allocation5], %s2319_s19 }
  0x59   : > { %s189_s12 = scalar_lea.vmem (!%p2277_p10), [#allocation4], %s917_s5  ;;  %p2896_p11 = scmp.ne.s32.totalorder (!%p2277_p10), %s2889_s6, 0 }
  0x5e   : > { %1860 = dma.done.wait (%p2896_p11), %s186_s11, 128  }
  0x5f   : > { %1862 = vsyncadd (%p2896_p11), %s186_s11, 4294967168  ;;  %s918_s10 = sshll.u32 %s2319_s19, 7  ;;  %s195_s18 = scalar_lea.sflag [#allocation8], %s2319_s19 }
  0x60   : > { %s2329_s14 = scalar_lea.vmem [#allocation7], %s918_s10 }
  0x61   : > { %1864 = dma.done.wait (%p2896_p11), %s195_s18, 2048  }
  0x62   : > { %1866 = vsyncadd (%p2896_p11), %s195_s18, 4294965248  ;;  %s2336_s28 = smul.u32 6, %s1885_s25  ;;  %v2345_v0 = vld [vmem:[%s189_s12] sm:$0xff]  ;;  %v2375_v40 = vmov 0.0   ;;  %v2377_v41 = vmov 0.0   ;;  %v2379_v42 = vmov 0.0  }
  0x63   : > { %s977_s4 = smul.u32 216, %s2319_s19  ;;  %v919_v1 = vadd.f32 -4.0, %v2345_v0  ;;  %v228_v2 = vadd.f32 4.0, %v2345_v0  ;;  %v2381_v43 = vmov 0.0   ;;  %v2383_v44 = vmov 0.0  }
  0x64   : > { %s2340_s15 = sld [smem:[#allocation3 + %s2336_s28]]   ;;  %s268_s13 = sadd.s32 1, %s2336_s28  ;;  %v2385_v45 = vmov 0.0   ;;  %v2387_v46 = vmov 0.0   ;;  %v2389_v47 = vmov 0.0   ;;  %v2391_v48 = vmov 0.0  }
  0x65   : > { %s2343_s16 = sld [smem:[#allocation3 + %s268_s13]]  ;;  %v229_v3 = vsub.f32 %v228_v2, %v919_v1  ;;  %s2370_s20 = scalar_lea.vmem [#allocation9], %s977_s4 }
  0x67   : > { %v231_v4 = vmul.f32 0.125, %v229_v3 }
  0x69   : > { %v232_v5 = vmul.f32 0.0, %v231_v4  ;;  %v236_v6 = vadd.f32 %v919_v1, %v231_v4  ;;  %v239_v7 = vmul.f32 2.0, %v231_v4  ;;  %v243_v8 = vmul.f32 3.0, %v231_v4 }
  0x6a   : > { %v247_v9 = vmul.f32 4.0, %v231_v4  ;;  %v251_v10 = vmul.f32 5.0, %v231_v4  ;;  %v255_v11 = vmul.f32 6.0, %v231_v4  ;;  %v259_v12 = vmul.f32 7.0, %v231_v4 }
  0x6b   : > { %s270_s6 = sadd.s32 1, %s2343_s16  ;;  %v233_v13 = vadd.f32 %v919_v1, %v232_v5  ;;  %v237_v14 = vmax.f32 %v236_v6, 0.0  ;;  %v240_v15 = vadd.f32 %v919_v1, %v239_v7  ;;  %v244_v16 = vadd.f32 %v919_v1, %v243_v8 }
  0x6c   : > { %v248_v17 = vadd.f32 %v919_v1, %v247_v9  ;;  %v252_v18 = vadd.f32 %v919_v1, %v251_v10  ;;  %v256_v19 = vadd.f32 %v919_v1, %v255_v11  ;;  %v260_v20 = vadd.f32 %v919_v1, %v259_v12  ;;  %p771_p3 = scmp.ge.s32.totalorder %s2340_s15, %s270_s6 }
  0x6d   : > { %v234_v21 = vmax.f32 %v233_v13, 0.0  ;;  %v2350_v22 = vmin.f32 %v237_v14, 15.0  ;;  %v241_v23 = vmax.f32 %v240_v15, 0.0  ;;  %v245_v24 = vmax.f32 %v244_v16, 0.0 }
  0x6e   : > { %v249_v25 = vmax.f32 %v248_v17, 0.0  ;;  %v253_v26 = vmax.f32 %v252_v18, 0.0  ;;  %v257_v27 = vmax.f32 %v256_v19, 0.0  ;;  %v261_v28 = vmax.f32 %v260_v20, 0.0 }
  0x6f   : > { %v2352_v29 = vmin.f32 %v234_v21, 15.0  ;;  %v2354_v30 = vmin.f32 %v241_v23, 15.0  ;;  %v2356_v31 = vmin.f32 %v245_v24, 15.0  ;;  %v263_v32 = vmul.f32 8.0, %v231_v4  ;;  %781 = sbr.rel (%p771_p3) target bundleno = 144 (0x90), region = 134 }
  0x70   : > { %v2358_v33 = vmin.f32 %v249_v25, 15.0  ;;  %v2360_v34 = vmin.f32 %v253_v26, 15.0  ;;  %v2362_v35 = vmin.f32 %v257_v27, 15.0  ;;  %v2364_v36 = vmin.f32 %v261_v28, 15.0 }
  0x71   : > { %v264_v37 = vadd.f32 %v919_v1, %v263_v32  ;;  %v2393_v49 = vmov (!%p771_p3), 0.0   ;;  %v2395_v50 = vmov (!%p771_p3), 0.0   ;;  %v2397_v51 = vmov (!%p771_p3), 0.0  }
  0x72   : > { %v2399_v52 = vmov (!%p771_p3), 0.0   ;;  %v2401_v53 = vmov (!%p771_p3), 0.0   ;;  %v2403_v54 = vmov (!%p771_p3), 0.0   ;;  %v2405_v55 = vmov (!%p771_p3), 0.0  }
  0x73   : > { %v265_v38 = vmax.f32 %v264_v37, 0.0  ;;  %v2407_v56 = vmov (!%p771_p3), 0.0   ;;  %v2409_v57 = vmov (!%p771_p3), 0.0  }
  0x75   : > { %v2366_v39 = vmin.f32 %v265_v38, 15.0 }
  0x76 LB: >> { %s286_s21 = scvt.s32.f32 %s1933_s15  ;;  %s920_s27 = sshll.u32 %s1933_s15, 3  ;;  %s1933_s15 = sphi %s2340_s15, %s274_s15   ;;  %v1929_v57 = vphi %v2409_v57, %v2905_v57   ;;  %v1925_v56 = vphi %v2407_v56, %v2904_v56   ;;  %v1921_v55 = vphi %v2405_v55, %v2903_v55   ;;  %v1917_v54 = vphi %v2403_v54, %v2902_v54   ;;  %v1913_v53 = vphi %v2401_v53, %v2901_v53   ;;  %v1909_v52 = vphi %v2399_v52, %v2900_v52   ;;  %v1905_v51 = vphi %v2397_v51, %v2899_v51   ;;  %v1901_v50 = vphi %v2395_v50, %v2898_v50   ;;  %v1897_v49 = vphi %v2393_v49, %v2897_v49  }
  0x77   : >> { %s288_s30 = scalar_lea.vmem %s2329_s14, %s920_s27 [#allocation7]  ;;  %s274_s15 = sadd.s32 1, %s1933_s15  }
  0x78   : >> { %v290_v58 = vstv %s286_s21  ;;  %v289_v15 = vld [vmem:[%s288_s30] sm:$0xff]  ;;  %p273_p8 = scmp.ge.s32.totalorder %s274_s15, %s270_s6 }
  0x79   : >> { %v291_v59 = vsub.f32 %v2352_v29, %v290_v58  ;;  %v297_v60 = vsub.f32 %v2350_v22, %v290_v58  ;;  %v303_v61 = vsub.f32 %v2354_v30, %v290_v58  ;;  %v309_v62 = vsub.f32 %v2356_v31, %v290_v58 }
  0x7a   : >> { %v315_v63 = vsub.f32 %v2358_v33, %v290_v58  ;;  %v321_v1 = vsub.f32 %v2360_v34, %v290_v58  ;;  %v327_v2 = vsub.f32 %v2362_v35, %v290_v58  ;;  %v333_v3 = vsub.f32 %v2364_v36, %v290_v58 }
  0x7b   : >> { %v292_v4 = vand.u32 2147483647, %v291_v59  ;;  %v298_v5 = vand.u32 2147483647, %v297_v60  ;;  %v304_v6 = vand.u32 2147483647, %v303_v61  ;;  %v339_v10 = vsub.f32 %v2366_v39, %v290_v58 }
  0x7c   : >> { %v310_v7 = vand.u32 2147483647, %v309_v62  ;;  %v316_v8 = vand.u32 2147483647, %v315_v63  ;;  %v322_v9 = vand.u32 2147483647, %v321_v1 }
  0x7d   : >> { %v293_v11 = vsub.f32 1.0, %v292_v4  ;;  %v299_v12 = vsub.f32 1.0, %v298_v5  ;;  %v305_v13 = vsub.f32 1.0, %v304_v6  ;;  %v328_v14 = vand.u32 2147483647, %v327_v2 }
  0x7e   : >> { %v311_v16 = vsub.f32 1.0, %v310_v7  ;;  %v317_v17 = vsub.f32 1.0, %v316_v8  ;;  %v323_v18 = vsub.f32 1.0, %v322_v9  ;;  %v334_v19 = vand.u32 2147483647, %v333_v3 }
  0x7f   : >> { %v294_v20 = vmax.f32 %v293_v11, 0.0  ;;  %v300_v21 = vmax.f32 %v299_v12, 0.0  ;;  %v306_v23 = vmax.f32 %v305_v13, 0.0  ;;  %v329_v24 = vsub.f32 1.0, %v328_v14 }
  0x80   : >> { %v312_v25 = vmax.f32 %v311_v16, 0.0  ;;  %v318_v26 = vmax.f32 %v317_v17, 0.0  ;;  %v324_v27 = vmax.f32 %v323_v18, 0.0  ;;  %v335_v28 = vsub.f32 1.0, %v334_v19 }
  0x81   : >> { %v295_v32 = vmul.f32 %v294_v20, %v289_v15  ;;  %v301_v37 = vmul.f32 %v300_v21, %v289_v15  ;;  %v307_v38 = vmul.f32 %v306_v23, %v289_v15  ;;  %v330_v40 = vmax.f32 %v329_v24, 0.0 }
  0x82   : >> { %v313_v41 = vmul.f32 %v312_v25, %v289_v15  ;;  %v319_v42 = vmul.f32 %v318_v26, %v289_v15  ;;  %v325_v43 = vmul.f32 %v324_v27, %v289_v15  ;;  %v336_v44 = vmax.f32 %v335_v28, 0.0 }
  0x83   : >> { %v296_v48 = vadd.f32 %v1929_v57, %v295_v32   ;;  %v302_v47 = vadd.f32 %v1925_v56, %v301_v37   ;;  %v308_v46 = vadd.f32 %v1921_v55, %v307_v38   ;;  %v331_v45 = vmul.f32 %v330_v40, %v289_v15 }
  0x84   : >> { %v314_v58 = vadd.f32 %v1917_v54, %v313_v41   ;;  %v320_v59 = vadd.f32 %v1913_v53, %v319_v42   ;;  %v326_v60 = vadd.f32 %v1909_v52, %v325_v43   ;;  %v337_v61 = vmul.f32 %v336_v44, %v289_v15 }
  0x85   : >> { %v332_v62 = vadd.f32 %v1905_v51, %v331_v45   ;;  %v340_v63 = vand.u32 2147483647, %v339_v10  ;;  %v2903_v55 = vmov %v308_v46  ;;  %v2904_v56 = vmov %v302_v47 }
  0x86   : >> { %v338_v1 = vadd.f32 %v1901_v50, %v337_v61   ;;  %v2900_v52 = vmov %v326_v60  ;;  %v2901_v53 = vmov %v320_v59  ;;  %v2902_v54 = vmov %v314_v58 }
  0x87   : >> { %v341_v2 = vsub.f32 1.0, %v340_v63  ;;  %v2899_v51 = vmov %v332_v62  ;;  %v2905_v57 = vmov %v296_v48  ;;  %v2908_v42 = vmov (%p273_p8), %v332_v62 }
  0x88   : >> { %v2898_v50 = vmov %v338_v1  ;;  %v2907_v41 = vmov (%p273_p8), %v338_v1  ;;  %v2909_v43 = vmov (%p273_p8), %v326_v60  ;;  %v2910_v44 = vmov (%p273_p8), %v320_v59 }
  0x89   : >> { %v342_v3 = vmax.f32 %v341_v2, 0.0  ;;  %276 = sbr.rel (!%p273_p8) target bundleno = 118 (0x76), region = 140  ;;  %v2911_v45 = vmov (%p273_p8), %v314_v58 }
  0x8b   : >> { %v343_v4 = vmul.f32 %v342_v3, %v289_v15 }
  0x8d   : >> { %v344_v5 = vadd.f32 %v1897_v49, %v343_v4  }
  0x8f   : >> { %v2897_v49 = vmov %v344_v5  ;;  %v2906_v40 = vmov (%p273_p8), %v344_v5 }
  0x90 PF: > { %345 = vst [vmem:[%s2370_s20] sm:$0xff] %v1969_v48  ;;  %921 = vst [vmem:[%s2370_s20 + $0x8] sm:$0xff] %v1965_v47  ;;  %v362_v22 = vmul.f32 0.5, %v2345_v0  ;;  %s402_s17 = sadd.s32 2, %s2336_s28  ;;  %s404_s5 = sadd.s32 3, %s2336_s28  ;;  %v2532_v32 = vmov 0.0   ;;  %v2534_v37 = vmov 0.0   ;;  %v1969_v48 = vphi %v2391_v48, %v296_v48   ;;  %v1965_v47 = vphi %v2389_v47, %v302_v47   ;;  %v1961_v46 = vphi %v2387_v46, %v308_v46   ;;  %v1957_v45 = vphi %v2385_v45, %v2911_v45   ;;  %v1953_v44 = vphi %v2383_v44, %v2910_v44   ;;  %v1949_v43 = vphi %v2381_v43, %v2909_v43   ;;  %v1945_v42 = vphi %v2379_v42, %v2908_v42   ;;  %v1941_v41 = vphi %v2377_v41, %v2907_v41   ;;  %v1937_v40 = vphi %v2375_v40, %v2906_v40  }
  0x91   : > { %922 = vst [vmem:[%s2370_s20 + $0x10] sm:$0xff] %v1961_v46  ;;  %923 = vst [vmem:[%s2370_s20 + $0x18] sm:$0xff] %v1957_v45  ;;  %s2506_s11 = sld [smem:[#allocation3 + %s402_s17]]   ;;  %v2536_v38 = vmov 0.0   ;;  %v2548_v48 = vmov 0.0  }
  0x92   : > { %924 = vst [vmem:[%s2370_s20 + $0x20] sm:$0xff] %v1953_v44  ;;  %925 = vst [vmem:[%s2370_s20 + $0x28] sm:$0xff] %v1949_v43  ;;  %s2508_s12 = sld [smem:[#allocation3 + %s404_s5]]  ;;  %v929_v29 = vadd.f32 -4.0, %v362_v22  ;;  %v364_v30 = vadd.f32 4.0, %v362_v22  ;;  %v2544_v43 = vmov 0.0  }
  0x93   : > { %926 = vst [vmem:[%s2370_s20 + $0x30] sm:$0xff] %v1945_v42  ;;  %927 = vst [vmem:[%s2370_s20 + $0x38] sm:$0xff] %v1941_v41  ;;  %v2540_v41 = vmov 0.0   ;;  %v2542_v42 = vmov 0.0   ;;  %v2546_v44 = vmov 0.0  }
  0x94   : > { %928 = vst [vmem:[%s2370_s20 + $0x40] sm:$0xff] %v1937_v40  ;;  %v365_v31 = vsub.f32 %v364_v30, %v929_v29  ;;  %v2538_v40 = vmov 0.0  }
  0x96   : > { %v366_v33 = vmul.f32 0.125, %v365_v31 }
  0x98   : > { %s406_s10 = sadd.s32 1, %s2508_s12  ;;  %v367_v34 = vmul.f32 0.0, %v366_v33  ;;  %v371_v35 = vadd.f32 %v929_v29, %v366_v33  ;;  %v374_v36 = vmul.f32 2.0, %v366_v33  ;;  %v378_v39 = vmul.f32 3.0, %v366_v33 }
  0x99   : > { %v382_v49 = vmul.f32 4.0, %v366_v33  ;;  %v386_v50 = vmul.f32 5.0, %v366_v33  ;;  %v390_v51 = vmul.f32 6.0, %v366_v33  ;;  %v394_v52 = vmul.f32 7.0, %v366_v33  ;;  %p803_p10 = scmp.ge.s32.totalorder %s2506_s11, %s406_s10 }
  0x9a   : > { %v368_v53 = vadd.f32 %v929_v29, %v367_v34  ;;  %v372_v54 = vmax.f32 %v371_v35, 0.0  ;;  %v375_v55 = vadd.f32 %v929_v29, %v374_v36  ;;  %v379_v56 = vadd.f32 %v929_v29, %v378_v39 }
  0x9b   : > { %v383_v57 = vadd.f32 %v929_v29, %v382_v49  ;;  %v387_v6 = vadd.f32 %v929_v29, %v386_v50  ;;  %v391_v7 = vadd.f32 %v929_v29, %v390_v51  ;;  %v395_v8 = vadd.f32 %v929_v29, %v394_v52 }
  0x9c   : > { %v369_v9 = vmax.f32 %v368_v53, 0.0  ;;  %v2511_v10 = vmin.f32 %v372_v54, 7.0  ;;  %v376_v11 = vmax.f32 %v375_v55, 0.0  ;;  %v380_v12 = vmax.f32 %v379_v56, 0.0 }
  0x9d   : > { %v384_v13 = vmax.f32 %v383_v57, 0.0  ;;  %v388_v14 = vmax.f32 %v387_v6, 0.0  ;;  %v392_v15 = vmax.f32 %v391_v7, 0.0  ;;  %v396_v16 = vmax.f32 %v395_v8, 0.0 }
  0x9e   : > { %v2513_v17 = vmin.f32 %v369_v9, 7.0  ;;  %v2515_v18 = vmin.f32 %v376_v11, 7.0  ;;  %v2517_v19 = vmin.f32 %v380_v12, 7.0  ;;  %v398_v20 = vmul.f32 8.0, %v366_v33  ;;  %813 = sbr.rel (%p803_p10) target bundleno = 191 (0xbf), region = 145 }
  0x9f   : > { %v2519_v21 = vmin.f32 %v384_v13, 7.0  ;;  %v2521_v23 = vmin.f32 %v388_v14, 7.0  ;;  %v2523_v24 = vmin.f32 %v392_v15, 7.0  ;;  %v2525_v25 = vmin.f32 %v396_v16, 7.0 }
  0xa0   : > { %v399_v26 = vadd.f32 %v929_v29, %v398_v20  ;;  %v2550_v47 = vmov (!%p803_p10), 0.0   ;;  %v2552_v46 = vmov (!%p803_p10), 0.0   ;;  %v2554_v45 = vmov (!%p803_p10), 0.0  }
  0xa1   : > { %v2556_v58 = vmov (!%p803_p10), 0.0   ;;  %v2558_v59 = vmov (!%p803_p10), 0.0   ;;  %v2560_v60 = vmov (!%p803_p10), 0.0   ;;  %v2562_v61 = vmov (!%p803_p10), 0.0  }
  0xa2   : > { %v400_v27 = vmax.f32 %v399_v26, 0.0  ;;  %v2564_v62 = vmov (!%p803_p10), 0.0   ;;  %v2566_v63 = vmov (!%p803_p10), 0.0  }
  0xa4   : > { %v2527_v28 = vmin.f32 %v400_v27, 7.0 }
  0xa5 LB: >> { %s422_s18 = scvt.s32.f32 %s2009_s11  ;;  %s970_s4 = sshll.u32 %s2009_s11, 4  ;;  %s2009_s11 = sphi %s2506_s11, %s410_s11   ;;  %v2005_v63 = vphi %v2566_v63, %v2920_v63   ;;  %v2001_v62 = vphi %v2564_v62, %v2919_v62   ;;  %v1997_v61 = vphi %v2562_v61, %v2918_v61   ;;  %v1993_v60 = vphi %v2560_v60, %v2917_v60   ;;  %v1989_v59 = vphi %v2558_v59, %v2916_v59   ;;  %v1985_v58 = vphi %v2556_v58, %v2915_v58   ;;  %v1981_v45 = vphi %v2554_v45, %v2914_v45   ;;  %v1977_v46 = vphi %v2552_v46, %v2913_v46   ;;  %v1973_v47 = vphi %v2550_v47, %v2912_v47  }
  0xa6   : >> { %s425_s15 = scalar_lea.vmem %s2329_s14, %s970_s4 [#allocation7]  ;;  %s410_s11 = sadd.s32 1, %s2009_s11  }
  0xa7   : >> { %v426_v1 = vld [vmem:[%s425_s15] sm:$0xff]  ;;  %v934_v2 = vld [vmem:[%s425_s15 + $0x8] sm:$0xff]  ;;  %v433_v3 = vstv %s422_s18  ;;  %p409_p2 = scmp.ge.s32.totalorder %s410_s11, %s406_s10 }
  0xa8   : >> { %v431_v4 = vadd.f32 %v934_v2, %v426_v1  ;;  %v434_v5 = vsub.f32 %v2513_v17, %v433_v3  ;;  %v440_v22 = vsub.f32 %v2511_v10, %v433_v3  ;;  %v446_v29 = vsub.f32 %v2515_v18, %v433_v3 }
  0xa9   : >> { %v452_v30 = vsub.f32 %v2517_v19, %v433_v3  ;;  %v458_v31 = vsub.f32 %v2519_v21, %v433_v3  ;;  %v464_v33 = vsub.f32 %v2521_v23, %v433_v3  ;;  %v470_v34 = vsub.f32 %v2523_v24, %v433_v3 }
  0xaa   : >> { %v432_v35 = vmul.f32 0.5, %v431_v4  ;;  %v435_v36 = vand.u32 2147483647, %v434_v5  ;;  %v441_v39 = vand.u32 2147483647, %v440_v22  ;;  %v476_v49 = vsub.f32 %v2525_v25, %v433_v3 }
  0xab   : >> { %v447_v50 = vand.u32 2147483647, %v446_v29  ;;  %v453_v51 = vand.u32 2147483647, %v452_v30  ;;  %v459_v52 = vand.u32 2147483647, %v458_v31  ;;  %v482_v53 = vsub.f32 %v2527_v28, %v433_v3 }
  0xac   : >> { %v436_v54 = vsub.f32 1.0, %v435_v36  ;;  %v442_v55 = vsub.f32 1.0, %v441_v39  ;;  %v465_v56 = vand.u32 2147483647, %v464_v33  ;;  %v471_v57 = vand.u32 2147483647, %v470_v34 }
  0xad   : >> { %v448_v6 = vsub.f32 1.0, %v447_v50  ;;  %v454_v7 = vsub.f32 1.0, %v453_v51  ;;  %v460_v8 = vsub.f32 1.0, %v459_v52  ;;  %v477_v9 = vand.u32 2147483647, %v476_v49 }
  0xae   : >> { %v437_v11 = vmax.f32 %v436_v54, 0.0  ;;  %v443_v12 = vmax.f32 %v442_v55, 0.0  ;;  %v466_v13 = vsub.f32 1.0, %v465_v56  ;;  %v472_v14 = vsub.f32 1.0, %v471_v57 }
  0xaf   : >> { %v449_v15 = vmax.f32 %v448_v6, 0.0  ;;  %v455_v16 = vmax.f32 %v454_v7, 0.0  ;;  %v461_v20 = vmax.f32 %v460_v8, 0.0  ;;  %v478_v26 = vsub.f32 1.0, %v477_v9 }
  0xb0   : >> { %v438_v27 = vmul.f32 %v437_v11, %v432_v35  ;;  %v444_v32 = vmul.f32 %v443_v12, %v432_v35  ;;  %v467_v37 = vmax.f32 %v466_v13, 0.0  ;;  %v473_v38 = vmax.f32 %v472_v14, 0.0 }
  0xb1   : >> { %v450_v40 = vmul.f32 %v449_v15, %v432_v35  ;;  %v456_v41 = vmul.f32 %v455_v16, %v432_v35  ;;  %v462_v42 = vmul.f32 %v461_v20, %v432_v35  ;;  %v479_v43 = vmax.f32 %v478_v26, 0.0 }
  0xb2   : >> { %v439_v48 = vadd.f32 %v2005_v63, %v438_v27   ;;  %v445_v44 = vadd.f32 %v2001_v62, %v444_v32   ;;  %v468_v1 = vmul.f32 %v467_v37, %v432_v35  ;;  %v474_v2 = vmul.f32 %v473_v38, %v432_v35 }
  0xb3   : >> { %v451_v3 = vadd.f32 %v1997_v61, %v450_v40   ;;  %v457_v4 = vadd.f32 %v1993_v60, %v456_v41   ;;  %v463_v5 = vadd.f32 %v1989_v59, %v462_v42   ;;  %v480_v22 = vmul.f32 %v479_v43, %v432_v35 }
  0xb4   : >> { %v469_v29 = vadd.f32 %v1985_v58, %v468_v1   ;;  %v475_v30 = vadd.f32 %v1981_v45, %v474_v2   ;;  %v483_v31 = vand.u32 2147483647, %v482_v53  ;;  %v2919_v62 = vmov %v445_v44 }
  0xb5   : >> { %v481_v33 = vadd.f32 %v1977_v46, %v480_v22   ;;  %v2916_v59 = vmov %v463_v5  ;;  %v2917_v60 = vmov %v457_v4  ;;  %v2918_v61 = vmov %v451_v3 }
  0xb6   : >> { %v484_v34 = vsub.f32 1.0, %v483_v31  ;;  %v2914_v45 = vmov %v475_v30  ;;  %v2915_v58 = vmov %v469_v29  ;;  %v2920_v63 = vmov %v439_v48 }
  0xb7   : >> { %v2913_v46 = vmov %v481_v33  ;;  %v2922_v37 = vmov (%p409_p2), %v481_v33  ;;  %v2923_v38 = vmov (%p409_p2), %v475_v30  ;;  %v2924_v40 = vmov (%p409_p2), %v469_v29 }
  0xb8   : >> { %v485_v36 = vmax.f32 %v484_v34, 0.0  ;;  %412 = sbr.rel (!%p409_p2) target bundleno = 165 (0xa5), region = 151  ;;  %v2925_v41 = vmov (%p409_p2), %v463_v5  ;;  %v2926_v42 = vmov (%p409_p2), %v457_v4  ;;  %v2927_v43 = vmov (%p409_p2), %v451_v3 }
  0xba   : >> { %v486_v39 = vmul.f32 %v485_v36, %v432_v35 }
  0xbc   : >> { %v487_v49 = vadd.f32 %v1973_v47, %v486_v39  }
  0xbe   : >> { %v2912_v47 = vmov %v487_v49  ;;  %v2921_v32 = vmov (%p409_p2), %v487_v49 }
  0xbf PF: > { %935 = vst [vmem:[%s2370_s20 + $0x48] sm:$0xff] %v2045_v48  ;;  %936 = vst [vmem:[%s2370_s20 + $0x50] sm:$0xff] %v2041_v44  ;;  %v506_v10 = vmul.f32 0.25, %v2345_v0  ;;  %s546_s13 = sadd.s32 4, %s2336_s28  ;;  %s548_s16 = sadd.s32 5, %s2336_s28  ;;  %v2692_v27 = vmov 0.0   ;;  %v2045_v48 = vphi %v2548_v48, %v439_v48   ;;  %v2041_v44 = vphi %v2546_v44, %v445_v44   ;;  %v2037_v43 = vphi %v2544_v43, %v2927_v43   ;;  %v2033_v42 = vphi %v2542_v42, %v2926_v42   ;;  %v2029_v41 = vphi %v2540_v41, %v2925_v41   ;;  %v2025_v40 = vphi %v2538_v40, %v2924_v40   ;;  %v2021_v38 = vphi %v2536_v38, %v2923_v38   ;;  %v2017_v37 = vphi %v2534_v37, %v2922_v37   ;;  %v2013_v32 = vphi %v2532_v32, %v2921_v32  }
  0xc0   : > { %937 = vst [vmem:[%s2370_s20 + $0x58] sm:$0xff] %v2037_v43  ;;  %938 = vst [vmem:[%s2370_s20 + $0x60] sm:$0xff] %v2033_v42  ;;  %s2666_s6 = sld [smem:[#allocation3 + %s546_s13]]   ;;  %v2704_v42 = vmov 0.0   ;;  %v2706_v43 = vmov 0.0   ;;  %v2708_v48 = vmov 0.0  }
  0xc1   : > { %939 = vst [vmem:[%s2370_s20 + $0x68] sm:$0xff] %v2029_v41  ;;  %940 = vst [vmem:[%s2370_s20 + $0x70] sm:$0xff] %v2025_v40  ;;  %s2668_s21 = sld [smem:[#allocation3 + %s548_s16]]  ;;  %v944_v17 = vadd.f32 -4.0, %v506_v10  ;;  %v508_v18 = vadd.f32 4.0, %v506_v10  ;;  %v2700_v40 = vmov 0.0  }
  0xc2   : > { %941 = vst [vmem:[%s2370_s20 + $0x78] sm:$0xff] %v2021_v38  ;;  %942 = vst [vmem:[%s2370_s20 + $0x80] sm:$0xff] %v2017_v37  ;;  %v2696_v37 = vmov 0.0   ;;  %v2698_v38 = vmov 0.0   ;;  %v2702_v41 = vmov 0.0  }
  0xc3   : > { %943 = vst [vmem:[%s2370_s20 + $0x88] sm:$0xff] %v2013_v32  ;;  %v509_v19 = vsub.f32 %v508_v18, %v944_v17  ;;  %v2694_v32 = vmov 0.0  }
  0xc5   : > { %v510_v21 = vmul.f32 0.125, %v509_v19 }
  0xc7   : > { %s550_s27 = sadd.s32 1, %s2668_s21  ;;  %v511_v23 = vmul.f32 0.0, %v510_v21  ;;  %v515_v24 = vadd.f32 %v944_v17, %v510_v21  ;;  %v518_v25 = vmul.f32 2.0, %v510_v21  ;;  %v522_v28 = vmul.f32 3.0, %v510_v21 }
  0xc8   : > { %v526_v47 = vmul.f32 4.0, %v510_v21  ;;  %v530_v46 = vmul.f32 5.0, %v510_v21  ;;  %v534_v45 = vmul.f32 6.0, %v510_v21  ;;  %v538_v0 = vmul.f32 7.0, %v510_v21  ;;  %p835_p13 = scmp.ge.s32.totalorder %s2666_s6, %s550_s27 }
  0xc9   : > { %v512_v58 = vadd.f32 %v944_v17, %v511_v23  ;;  %v516_v59 = vmax.f32 %v515_v24, 0.0  ;;  %v519_v60 = vadd.f32 %v944_v17, %v518_v25  ;;  %v523_v61 = vadd.f32 %v944_v17, %v522_v28 }
  0xca   : > { %v527_v62 = vadd.f32 %v944_v17, %v526_v47  ;;  %v531_v63 = vadd.f32 %v944_v17, %v530_v46  ;;  %v535_v35 = vadd.f32 %v944_v17, %v534_v45  ;;  %v539_v50 = vadd.f32 %v944_v17, %v538_v0 }
  0xcb   : > { %v513_v51 = vmax.f32 %v512_v58, 0.0  ;;  %v2671_v52 = vmin.f32 %v516_v59, 3.0  ;;  %v520_v53 = vmax.f32 %v519_v60, 0.0  ;;  %v524_v54 = vmax.f32 %v523_v61, 0.0 }
  0xcc   : > { %v528_v55 = vmax.f32 %v527_v62, 0.0  ;;  %v532_v56 = vmax.f32 %v531_v63, 0.0  ;;  %v536_v57 = vmax.f32 %v535_v35, 0.0  ;;  %v540_v6 = vmax.f32 %v539_v50, 0.0 }
  0xcd   : > { %v2673_v7 = vmin.f32 %v513_v51, 3.0  ;;  %v2675_v8 = vmin.f32 %v520_v53, 3.0  ;;  %v2677_v9 = vmin.f32 %v524_v54, 3.0  ;;  %v542_v11 = vmul.f32 8.0, %v510_v21  ;;  %845 = sbr.rel (%p835_p13) target bundleno = 239 (0xef), region = 156 }
  0xce   : > { %v2679_v12 = vmin.f32 %v528_v55, 3.0  ;;  %v2681_v13 = vmin.f32 %v532_v56, 3.0  ;;  %v2683_v14 = vmin.f32 %v536_v57, 3.0  ;;  %v2685_v15 = vmin.f32 %v540_v6, 3.0 }
  0xcf   : > { %v543_v16 = vadd.f32 %v944_v17, %v542_v11  ;;  %v2710_v44 = vmov (!%p835_p13), 0.0   ;;  %v2712_v1 = vmov (!%p835_p13), 0.0   ;;  %v2714_v2 = vmov (!%p835_p13), 0.0  }
  0xd0   : > { %v2716_v3 = vmov (!%p835_p13), 0.0   ;;  %v2718_v4 = vmov (!%p835_p13), 0.0   ;;  %v2720_v5 = vmov (!%p835_p13), 0.0   ;;  %v2722_v22 = vmov (!%p835_p13), 0.0  }
  0xd1   : > { %v544_v20 = vmax.f32 %v543_v16, 0.0  ;;  %v2724_v29 = vmov (!%p835_p13), 0.0   ;;  %v2726_v30 = vmov (!%p835_p13), 0.0  }
  0xd3   : > { %v2687_v26 = vmin.f32 %v544_v20, 3.0 }
  0xd4 LB: >> { %s566_s28 = scvt.s32.f32 %s2085_s6  ;;  %s972_s30 = sshll.u32 %s2085_s6, 5  ;;  %s2085_s6 = sphi %s2666_s6, %s554_s6   ;;  %v2081_v30 = vphi %v2726_v30, %v2936_v30   ;;  %v2077_v29 = vphi %v2724_v29, %v2935_v29   ;;  %v2073_v22 = vphi %v2722_v22, %v2934_v22   ;;  %v2069_v5 = vphi %v2720_v5, %v2933_v5   ;;  %v2065_v4 = vphi %v2718_v4, %v2932_v4   ;;  %v2061_v3 = vphi %v2716_v3, %v2931_v3   ;;  %v2057_v2 = vphi %v2714_v2, %v2930_v2   ;;  %v2053_v1 = vphi %v2712_v1, %v2929_v1   ;;  %v2049_v44 = vphi %v2710_v44, %v2928_v44  }
  0xd5   : >> { %s569_s17 = scalar_lea.vmem %s2329_s14, %s972_s30 [#allocation7]  ;;  %s554_s6 = sadd.s32 1, %s2085_s6  }
  0xd6   : >> { %v570_v31 = vld [vmem:[%s569_s17] sm:$0xff]  ;;  %v949_v33 = vld [vmem:[%s569_s17 + $0x8] sm:$0xff]  ;;  %v952_v34 = vld [vmem:[%s569_s17 + $0x10] sm:$0xff]  ;;  %v591_v36 = vstv %s566_s28  ;;  %p553_p1 = scmp.ge.s32.totalorder %s554_s6, %s550_s27 }
  0xd7   : >> { %v575_v39 = vadd.f32 %v949_v33, %v570_v31  ;;  %v956_v49 = vld [vmem:[%s569_s17 + $0x18] sm:$0xff]  ;;  %v592_v10 = vsub.f32 %v2673_v7, %v591_v36  ;;  %v598_v17 = vsub.f32 %v2671_v52, %v591_v36  ;;  %v604_v18 = vsub.f32 %v2675_v8, %v591_v36 }
  0xd8   : >> { %v587_v19 = vadd.f32 %v956_v49, %v952_v34  ;;  %v610_v21 = vsub.f32 %v2677_v9, %v591_v36  ;;  %v616_v23 = vsub.f32 %v2679_v12, %v591_v36  ;;  %v622_v24 = vsub.f32 %v2681_v13, %v591_v36 }
  0xd9   : >> { %v576_v25 = vmul.f32 0.5, %v575_v39  ;;  %v593_v28 = vand.u32 2147483647, %v592_v10  ;;  %v599_v47 = vand.u32 2147483647, %v598_v17  ;;  %v628_v46 = vsub.f32 %v2683_v14, %v591_v36 }
  0xda   : >> { %v588_v45 = vmul.f32 0.5, %v587_v19  ;;  %v605_v0 = vand.u32 2147483647, %v604_v18  ;;  %v611_v58 = vand.u32 2147483647, %v610_v21  ;;  %v634_v59 = vsub.f32 %v2685_v15, %v591_v36 }
  0xdb   : >> { %v594_v60 = vsub.f32 1.0, %v593_v28  ;;  %v600_v61 = vsub.f32 1.0, %v599_v47  ;;  %v617_v62 = vand.u32 2147483647, %v616_v23  ;;  %v623_v63 = vand.u32 2147483647, %v622_v24 }
  0xdc   : >> { %v589_v35 = vadd.f32 %v588_v45, %v576_v25  ;;  %v606_v50 = vsub.f32 1.0, %v605_v0  ;;  %v612_v51 = vsub.f32 1.0, %v611_v58  ;;  %v629_v53 = vand.u32 2147483647, %v628_v46 }
  0xdd   : >> { %v595_v54 = vmax.f32 %v594_v60, 0.0  ;;  %v601_v55 = vmax.f32 %v600_v61, 0.0  ;;  %v618_v56 = vsub.f32 1.0, %v617_v62  ;;  %v624_v57 = vsub.f32 1.0, %v623_v63 }
  0xde   : >> { %v590_v6 = vmul.f32 0.5, %v589_v35  ;;  %v607_v11 = vmax.f32 %v606_v50, 0.0  ;;  %v613_v16 = vmax.f32 %v612_v51, 0.0  ;;  %v630_v20 = vsub.f32 1.0, %v629_v53 }
  0xdf   : >> { %v619_v27 = vmax.f32 %v618_v56, 0.0  ;;  %v625_v32 = vmax.f32 %v624_v57, 0.0  ;;  %v635_v37 = vand.u32 2147483647, %v634_v59  ;;  %v640_v38 = vsub.f32 %v2687_v26, %v591_v36 }
  0xe0   : >> { %v596_v40 = vmul.f32 %v595_v54, %v590_v6  ;;  %v602_v41 = vmul.f32 %v601_v55, %v590_v6  ;;  %v608_v42 = vmul.f32 %v607_v11, %v590_v6  ;;  %v614_v43 = vmul.f32 %v613_v16, %v590_v6 }
  0xe1   : >> { %v620_v48 = vmul.f32 %v619_v27, %v590_v6  ;;  %v626_v31 = vmul.f32 %v625_v32, %v590_v6  ;;  %v631_v33 = vmax.f32 %v630_v20, 0.0  ;;  %v636_v34 = vsub.f32 1.0, %v635_v37 }
  0xe2   : >> { %v597_v39 = vadd.f32 %v2081_v30, %v596_v40   ;;  %v603_v49 = vadd.f32 %v2077_v29, %v602_v41   ;;  %v609_v10 = vadd.f32 %v2073_v22, %v608_v42   ;;  %v615_v17 = vadd.f32 %v2069_v5, %v614_v43  }
  0xe3   : >> { %v621_v18 = vadd.f32 %v2065_v4, %v620_v48   ;;  %v627_v19 = vadd.f32 %v2061_v3, %v626_v31   ;;  %v632_v21 = vmul.f32 %v631_v33, %v590_v6  ;;  %v637_v23 = vmax.f32 %v636_v34, 0.0 }
  0xe4   : >> { %v641_v24 = vand.u32 2147483647, %v640_v38  ;;  %v2933_v5 = vmov %v615_v17  ;;  %v2934_v22 = vmov %v609_v10  ;;  %v2935_v29 = vmov %v603_v49 }
  0xe5   : >> { %v633_v36 = vadd.f32 %v2057_v2, %v632_v21   ;;  %v638_v25 = vmul.f32 %v637_v23, %v590_v6  ;;  %v2931_v3 = vmov %v627_v19  ;;  %v2932_v4 = vmov %v621_v18 }
  0xe6   : >> { %v642_v28 = vsub.f32 1.0, %v641_v24  ;;  %v2936_v30 = vmov %v597_v39  ;;  %v2940_v38 = vmov (%p553_p1), %v627_v19  ;;  %v2941_v40 = vmov (%p553_p1), %v621_v18 }
  0xe7   : >> { %v639_v47 = vadd.f32 %v2053_v1, %v638_v25   ;;  %v2930_v2 = vmov %v633_v36  ;;  %v2939_v37 = vmov (%p553_p1), %v633_v36  ;;  %v2942_v41 = vmov (%p553_p1), %v615_v17 }
  0xe8   : >> { %v643_v46 = vmax.f32 %v642_v28, 0.0  ;;  %556 = sbr.rel (!%p553_p1) target bundleno = 212 (0xd4), region = 162  ;;  %v2943_v42 = vmov (%p553_p1), %v609_v10  ;;  %v2944_v43 = vmov (%p553_p1), %v603_v49  ;;  %v2945_v48 = vmov (%p553_p1), %v597_v39 }
  0xe9   : >> { %v2929_v1 = vmov %v639_v47  ;;  %v2938_v32 = vmov (%p553_p1), %v639_v47 }
  0xea   : >> { %v644_v45 = vmul.f32 %v643_v46, %v590_v6 }
  0xec   : >> { %v645_v0 = vadd.f32 %v2049_v44, %v644_v45  }
  0xee   : >> { %v2928_v44 = vmov %v645_v0  ;;  %v2937_v27 = vmov (%p553_p1), %v645_v0 }
  0xef PF: > { %957 = vst [vmem:[%s2370_s20 + $0x90] sm:$0xff] %v2121_v48  ;;  %958 = vst [vmem:[%s2370_s20 + $0x98] sm:$0xff] %v2117_v43  ;;  %s978_s14 = smul.u32 3456, %s1885_s25  ;;  %s679_s5 = sshll.u32 %s2370_s20, 4  ;;  %v2121_v48 = vphi %v2708_v48, %v2945_v48   ;;  %v2117_v43 = vphi %v2706_v43, %v2944_v43   ;;  %v2113_v42 = vphi %v2704_v42, %v2943_v42   ;;  %v2109_v41 = vphi %v2702_v41, %v2942_v41   ;;  %v2105_v40 = vphi %v2700_v40, %v2941_v40   ;;  %v2101_v38 = vphi %v2698_v38, %v2940_v38   ;;  %v2097_v37 = vphi %v2696_v37, %v2939_v37   ;;  %v2093_v32 = vphi %v2694_v32, %v2938_v32   ;;  %v2089_v27 = vphi %v2692_v27, %v2937_v27   ;;  %s2833_s5 = int_to_ptr.vmem [resolvable:$true] %s679_s5 }
  0xf0   : > { %959 = vst [vmem:[%s2370_s20 + $0xa0] sm:$0xff] %v2113_v42  ;;  %960 = vst [vmem:[%s2370_s20 + $0xa8] sm:$0xff] %v2109_v41  ;;  %s665_s18 = scalar_lea.sflag [#allocation6], %s2319_s19  ;;  %s1577_s4 = scalar_lea.vmem %s2833_s5, 3456 }
  0xf1   : > { %961 = vst [vmem:[%s2370_s20 + $0xb0] sm:$0xff] %v2105_v40  ;;  %962 = vst [vmem:[%s2370_s20 + $0xb8] sm:$0xff] %v2101_v38  ;;  %s2831_s10 = scalar_lea.hbm %s2885_s3, %s978_s14  ;;  %p1578_p4 = scmp.ne.s32.totalorder %s2833_s5, %s1577_s4 }
  0xf2   : > { %963 = vst [vmem:[%s2370_s20 + $0xc0] sm:$0xff] %v2097_v37  ;;  %964 = vst [vmem:[%s2370_s20 + $0xc8] sm:$0xff] %v2093_v32  ;;  %p2946_p5 = scmp.ne.s32.totalorder %s2890_s7, 0  ;;  %s2128_s15 = smov [#allocation9]  }
  0xf3   : > { %965 = vst [vmem:[%s2370_s20 + $0xd0] sm:$0xff] %v2089_v27  ;;  %s1581_s13 = sshll.u32 %s2128_s15, 4  ;;  %s1582_s13 = int_to_ptr.vmem [resolvable:$false] %s1581_s13 }
  0xf4   : > { %p1579_p12 = pnand %p1578_p4, %p2946_p5  ;;  %s1583_s25 = scalar_lea.vmem %s1582_s13, 6912 }
  0xf5   : > { %p1584_p6 = scmp.lt.s32.totalorder %s2833_s5, %s1582_s13  ;;  %p1585_p9 = scmp.lt.s32.totalorder %s1583_s25, %s1577_s4 }
  0xf6   : > { %p1580_p0 = pneg %p1579_p12 }
  0xf7   : > { %p1586_p7 = por %p1585_p9, %p1584_p6 }
  0xf9   : > { %p1587_p11 = pnand %p1586_p7, %p1580_p0 }
  0xfb   : > { %1590 = shalt.err (!%p1587_p11)
}
  0xfc   : > { %s1591_s20 = scalar_lea.hbm %s2831_s10, 3456  ;;  %s1595_s21 = scalar_lea.hbm %s2885_s3, 6912 }
  0xfd   : > { %p1592_p3 = scmp.ne.s32.totalorder %s2831_s10, %s1591_s20  ;;  %p1596_p2 = scmp.lt.u32.totalorder %s2831_s10, %s2885_s3 }
  0xfe   : > { %p1597_p13 = scmp.lt.u32.totalorder %s1595_s21, %s1591_s20  ;;  %p1599_p4 = scmp.lt.u32.totalorder %s1591_s20, %s2831_s10 }
  0xff   : > { %p1593_p8 = pnand %p1592_p3, %p2946_p5 }
 0x100   : > { %p1598_p1 = por %p1597_p13, %p1596_p2 }
 0x101   : > { %p1594_p10 = pneg %p1593_p8 }
 0x102   : > { %p1600_p12 = por %p1599_p4, %p1598_p1 }
 0x104   : > { %p1601_p0 = pnand %p1600_p12, %p1594_p10 }
 0x106   : > { %1604 = shalt.err (!%p1601_p0)
}
 0x107   : > { %s2129_s30 = smov 128   ;;  %s2130_s17 = smov 8  }
 0x108   : > { %983 = dma.vmem_to_hbm [thread:$0]  (%p2946_p5), %s2833_s5, 3456, %s2831_s10, %s665_s18, %s2129_s30, %s2129_s30, %s2130_s17  }
 0x109 PF: > { %s694_s14 = sand.u32 1, %s1873_s22   ;;  %p2947_p6 = scmp.ne.s32.totalorder %s2891_s9, 0 }
 0x10a   : > { %p2948_p9 = scmp.ge.s32.totalorder %s1893_s0, 2  ;;  %s695_s11 = scalar_lea.sflag [#allocation6], %s694_s14 }
 0x10c   : > { %p993_p7 = pnand %p2948_p9, %p2947_p6 }
 0x10e   : > { %1868 = dma.done.wait (!%p993_p7), %s695_s11, 3456  }
 0x10f   : > { %1870 = vsyncadd (!%p993_p7), %s695_s11, 4294963840  ;;  %s26_s0 = sadd.s32 1, %s1893_s0   ;;  %s2949_s22 = smov %s1877_s23 }
 0x110   : > { %p23_p11 = scmp.ge.s32.totalorder %s26_s0, 4   ;;  %s2950_s23 = smov %s1881_s24 }
 0x111   : > { %s2951_s24 = smov %s2219_s8  ;;  %s2952_s25 = smov %s1889_s26 }
 0x112   : > { %s2953_s26 = smov %s2955_s29  ;;  %25 = sbr.rel (!%p23_p11) target bundleno = 20 (0x14), region = 173 }
 0x119   :  { %700 = vsyncpa [#allocation5], 1 }
 0x11a   :  { %702 = vsyncpa [#allocation5 + $0x1], 1 }
 0x11b   :  { %703 = vsyncpa [#allocation8], 1 }
 0x11c   :  { %705 = vsyncpa [#allocation8 + $0x1], 1 }
 0x11d   :  { %706 = vsyncpa [#allocation6], 1 }
 0x11e   :  { %708 = vsyncpa [#allocation6 + $0x1], 1 }

</bundles_post_ra>
